<compile_context>
chip_gen: v7x
topology: tpu7x:2x2x1
jax: 0.10.0
libtpu: 0.0.40
codegen_flags: <defaults>
</compile_context>

<pallas_src>
import functools
import math

import numpy as np

import jax
import jax.numpy as jnp
from jax.experimental import pallas as pl
from jax.experimental.pallas import tpu as pltpu


def _round_up(v, m):
    return ((v + m - 1) // m) * m


def _padded_bytes(shape, dtype):
    """Vreg-layout-aware footprint: last dim -> 128 lanes, 2nd-last -> sublanes."""
    it = jnp.dtype(dtype).itemsize
    dims = list(shape) if len(shape) else [1]
    dims[-1] = _round_up(dims[-1], 128)
    if len(dims) >= 2:
        dims[-2] = _round_up(dims[-2], max(1, 32 // it))
    n = 1
    for d in dims:
        n *= d
    return n * it


# ---------------------------------------------------------------------------
# Fused MBConv kernel: one batch element per grid step.
# Layout inside the kernel: [channels (sublanes), flattened padded spatial (lanes)].
# ---------------------------------------------------------------------------
def _fused_mbconv_kernel(*refs, k, pad, Wp, inv_n_out, has_expand, use_residual):
    if has_expand:
        (x_ref, in_mask_ref, out_mask_ref, w_exp_ref, b1_ref,
         w_dw_ref, b2_ref, w_se1_ref, b_se1_ref, w_se2_ref, b_se2_ref,
         w_proj_ref, b3_ref, o_ref) = refs
    else:
        (x_ref, in_mask_ref, out_mask_ref,
         w_dw_ref, b2_ref, w_se1_ref, b_se1_ref, w_se2_ref, b_se2_ref,
         w_proj_ref, b3_ref, o_ref) = refs

    Sa = x_ref.shape[-1]                     # lane length (multiple of 128)

    # --- 1) expansion 1x1 conv (BN scale pre-folded into weights) + Swish ----
    if has_expand:
        # [Cmed, Cin] @ [Cin, Sa] -> [Cmed, Sa] on the MXU, spatial in lanes.
        ex = jnp.dot(w_exp_ref[...], x_ref[0],
                     preferred_element_type=jnp.float32)
        ex = ex + b1_ref[...]                            # [Cmed, 1] lane-broadcast
        ex = ex * jax.nn.sigmoid(ex)                     # Swish
        ex = ex * in_mask_ref[...]                       # re-zero halo / flat pad
    else:
        ex = x_ref[0].astype(jnp.float32)                # already zero padded

    # --- 2) depthwise kxk conv: lane rolls (XLU) + per-channel FMA (VPU) -----
    # Tap (dy, dx) of output position p = i*Wp + j is ex[p + dy*Wp + dx]:
    # a pure lane shift in the flattened layout (no unaligned sublane slices).
    acc = None
    for dy in range(k):
        for dx in range(k):
            s = dy * Wp + dx                             # lane shift amount
            t = dy * k + dx                              # tap index
            shifted = ex if s == 0 else pltpu.roll(ex, shift=Sa - s, axis=1)
            term = shifted * w_dw_ref[:, t:t + 1]        # [Cmed, 1] per-channel tap
            acc = term if acc is None else acc + term    # first tap seeds acc
    y = acc + b2_ref[...]
    y = y * jax.nn.sigmoid(y)                            # Swish

    # --- 3) Squeeze-and-Excitation, kept on VPU/XLU (no MXU push/drain) ------
    pooled = jnp.sum(y * out_mask_ref[...], axis=1, keepdims=True) * inv_n_out
    h = jnp.sum(w_se1_ref[...] * pooled, axis=0, keepdims=True) + b_se1_ref[...]
    h = h * jax.nn.sigmoid(h)                            # Swish, [1, Csq]
    g = jnp.sum(w_se2_ref[...] * h, axis=1, keepdims=True) + b_se2_ref[...]
    y = y * jax.nn.sigmoid(g)                            # gate, [Cmed, 1]

    # --- 4) projection 1x1 (BN scale pre-folded) + bias (+ residual) ---------
    out = jnp.dot(w_proj_ref[...], y.astype(w_proj_ref.dtype),
                  preferred_element_type=jnp.float32)    # [Cout, Sa]
    out = out + b3_ref[...]
    if use_residual:
        d = pad * Wp + pad                               # interior offset of x
        res = x_ref[0] if d == 0 else pltpu.roll(x_ref[0], shift=Sa - d, axis=1)
        out = out + res.astype(jnp.float32)
    o_ref[0] = out.astype(o_ref.dtype)


# ---------------------------------------------------------------------------
# Full BMConvBlock forward (NCHW in / NCHW out, like the PyTorch module).
# ---------------------------------------------------------------------------
@functools.partial(jax.jit, static_argnames=("stride", "kernel_size",
                                             "expand_ratio", "use_residual"))
def bmconv_block_forward(x_nchw, params, *, stride, kernel_size,
                         expand_ratio, use_residual):
    k = kernel_size
    pad = k // 2
    N, Cin, H, W = x_nchw.shape
    Hp, Wp = H + 2 * pad, W + 2 * pad
    S = Hp * Wp
    Sa = _round_up(S, 128)                              # lane-dense flat spatial
    Ho = (Hp - k) // stride + 1
    Wo = (Wp - k) // stride + 1
    has_expand = (expand_ratio != 1.0)

    Cmed = params["w_dw"].shape[-1]
    Cout = params["w_proj"].shape[1]
    Csq = params["w_se1"].shape[1]
    if use_residual:
        assert stride == 1 and Cin == Cout
    dt = params["w_dw"].dtype
    f32 = jnp.float32

    # --- channels-in-sublanes / flattened-spatial-in-lanes input layout ------
    xp = jnp.pad(x_nchw, ((0, 0), (0, 0), (pad, pad), (pad, pad)))
    x_flat = jnp.pad(xp.reshape(N, Cin, S), ((0, 0), (0, 0), (0, Sa - S)))

    # --- static interior / valid-output lane masks (trace-time constants) ----
    yy, xx = np.meshgrid(np.arange(Hp), np.arange(Wp), indexing="ij")
    in_m = ((yy >= pad) & (yy < pad + H) & (xx >= pad) & (xx < pad + W))
    out_m = ((yy % stride == 0) & (yy < Ho * stride) &
             (xx % stride == 0) & (xx < Wo * stride))
    in_mask_np = np.zeros((1, Sa), np.float32)
    out_mask_np = np.zeros((1, Sa), np.float32)
    in_mask_np[0, :S] = in_m.reshape(-1)
    out_mask_np[0, :S] = out_m.reshape(-1)
    in_mask = jnp.asarray(in_mask_np)
    out_mask = jnp.asarray(out_mask_np)

    # --- fold BN scales into conv weights; transpose to [C_out, *] MXU lhs ---
    if has_expand:
        w_exp_t = (params["w_exp"].astype(f32).T *
                   params["bn1_scale"].astype(f32)[:, None]).astype(dt)   # [Cmed, Cin]
        b1 = params["bn1_bias"].astype(f32).reshape(Cmed, 1)
    w_dw_t = (params["w_dw"].astype(f32).reshape(k * k, Cmed).T *
              params["bn2_scale"].astype(f32)[:, None]).astype(dt)        # [Cmed, k*k]
    b2 = params["bn2_bias"].astype(f32).reshape(Cmed, 1)
    w_se1 = params["w_se1"]                                               # [Cmed, Csq]
    b_se1 = params["b_se1"].astype(f32).reshape(1, Csq)
    w_se2_t = params["w_se2"].T                                           # [Cmed, Csq]
    b_se2 = params["b_se2"].astype(f32).reshape(Cmed, 1)
    w_proj_t = (params["w_proj"].astype(f32).T *
                params["bn3_scale"].astype(f32)[:, None]).astype(dt)      # [Cout, Cmed]
    b3 = params["bn3_bias"].astype(f32).reshape(Cout, 1)

    def _rep(shape):                                     # replicated weight spec
        nd = len(shape)
        return pl.BlockSpec(shape, lambda n: (0,) * nd)

    in_specs = [pl.BlockSpec((1, Cin, Sa), lambda n: (n, 0, 0)),
                _rep((1, Sa)), _rep((1, Sa))]
    args = [x_flat, in_mask, out_mask]
    if has_expand:
        in_specs += [_rep((Cmed, Cin)), _rep((Cmed, 1))]
        args += [w_exp_t, b1]
    in_specs += [_rep((Cmed, k * k)), _rep((Cmed, 1)),
                 _rep((Cmed, Csq)), _rep((1, Csq)),
                 _rep((Cmed, Csq)), _rep((Cmed, 1)),
                 _rep((Cout, Cmed)), _rep((Cout, 1))]
    args += [w_dw_t, b2, w_se1, b_se1, w_se2_t, b_se2, w_proj_t, b3]

    kernel = functools.partial(
        _fused_mbconv_kernel, k=k, pad=pad, Wp=Wp,
        inv_n_out=1.0 / float(Ho * Wo),
        has_expand=has_expand, use_residual=use_residual)

    # --- layout-padding-aware per-step VMEM bound (headroom for v7x 64 MiB) --
    est = 2 * _padded_bytes((1, Cin, Sa), x_flat.dtype)      # double-buffered input
    est += 2 * _padded_bytes((1, Cout, Sa), x_flat.dtype)    # double-buffered output
    for a in args[1:]:
        est += 2 * _padded_bytes(a.shape, a.dtype)           # masks + replicated weights
    est += 6 * _padded_bytes((Cmed, Sa), jnp.float32)        # in-kernel f32 temporaries
    vmem_limit = int(min(max(4 * est, 8 * 2 ** 20), 48 * 2 ** 20))

    out_flat = pl.pallas_call(
        kernel,
        out_shape=jax.ShapeDtypeStruct((N, Cout, Sa), x_nchw.dtype),
        grid=(N,),
        in_specs=in_specs,
        out_specs=pl.BlockSpec((1, Cout, Sa), lambda n: (n, 0, 0)),
        compiler_params=pltpu.CompilerParams(
            dimension_semantics=("parallel",),
            vmem_limit_bytes=vmem_limit),
    )(*args)

    # Crop / stride-select valid output positions wrapper-side (XLA, cheap).
    out4 = out_flat[:, :, :S].reshape(N, Cout, Hp, Wp)
    return out4[:, :, 0:Ho * stride:stride, 0:Wo * stride:stride]   # NCHW


# ---------------------------------------------------------------------------
# Parameter init (mirrors the PyTorch module's shapes & init distributions;
# BN folded to eval-mode scale/bias).
# ---------------------------------------------------------------------------
def init_params(key, ch_in, ch_out, expand_ratio, kernel_size,
                reduction_ratio=4, eps=1e-5, dtype=jnp.float32):
    ch_med = int(ch_in * expand_ratio)
    ch_sq = max(1, ch_in // reduction_ratio)
    keys = jax.random.split(key, 8)

    def kaiming_normal(k, shape, fan_in):
        return math.sqrt(2.0 / fan_in) * jax.random.normal(k, shape, jnp.float32)

    def conv_bias(k, shape, fan_in):
        bound = 1.0 / math.sqrt(fan_in)
        return jax.random.uniform(k, shape, jnp.float32, -bound, bound)

    def bn_eval(c):
        gamma = jnp.ones((c,), jnp.float32)
        beta = jnp.zeros((c,), jnp.float32)
        mean = jnp.zeros((c,), jnp.float32)
        var = jnp.ones((c,), jnp.float32)
        scale = gamma / jnp.sqrt(var + eps)
        return scale, beta - mean * scale

    p = {}
    if expand_ratio != 1.0:
        p["w_exp"] = kaiming_normal(keys[0], (ch_in, ch_med), ch_in)
        p["bn1_scale"], p["bn1_bias"] = bn_eval(ch_med)
    p["w_dw"] = kaiming_normal(keys[1], (kernel_size, kernel_size, ch_med),
                               kernel_size * kernel_size)
    p["bn2_scale"], p["bn2_bias"] = bn_eval(ch_med)
    p["w_se1"] = kaiming_normal(keys[2], (ch_med, ch_sq), ch_med)
    p["b_se1"] = conv_bias(keys[3], (ch_sq,), ch_med)
    p["w_se2"] = kaiming_normal(keys[4], (ch_sq, ch_med), ch_sq)
    p["b_se2"] = conv_bias(keys[5], (ch_med,), ch_sq)
    p["w_proj"] = kaiming_normal(keys[6], (ch_med, ch_out), ch_med)
    p["bn3_scale"], p["bn3_bias"] = bn_eval(ch_out)
    return jax.tree.map(lambda a: a.astype(dtype), p)


# ---------------------------------------------------------------------------
# Pure-JAX reference (same eval semantics) for a correctness check.
# ---------------------------------------------------------------------------
def _reference_forward(x_nchw, params, *, stride, kernel_size, expand_ratio,
                       use_residual):
    x = jnp.transpose(x_nchw, (0, 2, 3, 1)).astype(jnp.float32)   # NHWC
    h = x
    if expand_ratio != 1.0:
        h = jnp.einsum("nhwc,cd->nhwd", h, params["w_exp"])
        h = h * params["bn1_scale"] + params["bn1_bias"]
        h = h * jax.nn.sigmoid(h)
    k = kernel_size
    pad = k // 2
    Cmed = h.shape[-1]
    h = jax.lax.conv_general_dilated(
        h, params["w_dw"].reshape(k, k, 1, Cmed),
        window_strides=(stride, stride), padding=((pad, pad), (pad, pad)),
        dimension_numbers=("NHWC", "HWIO", "NHWC"),
        feature_group_count=Cmed)
    h = h * params["bn2_scale"] + params["bn2_bias"]
    h = h * jax.nn.sigmoid(h)
    pooled = jnp.mean(h, axis=(1, 2))
    s = pooled @ params["w_se1"] + params["b_se1"]
    s = s * jax.nn.sigmoid(s)
    s = s @ params["w_se2"] + params["b_se2"]
    h = h * jax.nn.sigmoid(s)[:, None, None, :]
    out = jnp.einsum("nhwc,cd->nhwd", h, params["w_proj"])
    out = out * params["bn3_scale"] + params["bn3_bias"]
    if use_residual:
        out = out + x
    return jnp.transpose(out, (0, 3, 1, 2))


if __name__ == "__main__":
    # BMConvBlock(ch_in=8, ch_out=8, expand_ratio=4, stride=1, kernel_size=3)
    #   -> ch_med = 32, ch_sq = 2, use_residual = True
    N, ch_in, H, W = 2, 8, 16, 16
    ch_out, expand_ratio, stride, ksz = 8, 4.0, 1, 3
    use_residual = (ch_in == ch_out) and (stride == 1)

    key = jax.random.PRNGKey(0)
    kx, kp = jax.random.split(key)
    x = jax.random.normal(kx, (N, ch_in, H, W), jnp.float32)
    params = init_params(kp, ch_in, ch_out, expand_ratio, ksz)

    out = bmconv_block_forward(x, params, stride=stride, kernel_size=ksz,
                               expand_ratio=expand_ratio,
                               use_residual=use_residual)
    jax.block_until_ready(out)
    assert out.shape == (N, ch_out, H, W), out.shape

    ref = _reference_forward(x, params, stride=stride, kernel_size=ksz,
                             expand_ratio=expand_ratio,
                             use_residual=use_residual)
    max_err = float(jnp.max(jnp.abs(out - ref)))
    assert max_err < 5e-3, f"max abs err vs reference: {max_err}"
    print("KERNEL_OK")
</pallas_src>

<mosaic_0001>
module attributes {stable_mosaic.version = 11 : i64} {
  func.func @_fused_mbconv_kernel(%arg0: i32, %arg1: memref<1x8x384xf32, #tpu.memory_space<vmem>>, %arg2: memref<1x384xf32, #tpu.memory_space<vmem>>, %arg3: memref<1x384xf32, #tpu.memory_space<vmem>>, %arg4: memref<32x8xf32, #tpu.memory_space<vmem>>, %arg5: memref<32x1xf32, #tpu.memory_space<vmem>>, %arg6: memref<32x9xf32, #tpu.memory_space<vmem>>, %arg7: memref<32x1xf32, #tpu.memory_space<vmem>>, %arg8: memref<32x2xf32, #tpu.memory_space<vmem>>, %arg9: memref<1x2xf32, #tpu.memory_space<vmem>>, %arg10: memref<32x2xf32, #tpu.memory_space<vmem>>, %arg11: memref<32x1xf32, #tpu.memory_space<vmem>>, %arg12: memref<8x32xf32, #tpu.memory_space<vmem>>, %arg13: memref<8x1xf32, #tpu.memory_space<vmem>>, %arg14: memref<1x8x384xf32, #tpu.memory_space<vmem>>) attributes {dimension_semantics = [#tpu.dimension_semantics<parallel>], iteration_bounds = array<i64: 2>, scalar_prefetch = 0 : i64, scratch_operands = 0 : i64, tpu.core_type = #tpu.core_type<tc>, window_params = [{transform_indices = @transform_0, window_bounds = array<i64: 1, 8, 384>}, {pipeline_mode = #tpu.pipeline_mode<synchronous>, transform_indices = @transform_1, window_bounds = array<i64: 1, 384>}, {pipeline_mode = #tpu.pipeline_mode<synchronous>, transform_indices = @transform_2, window_bounds = array<i64: 1, 384>}, {pipeline_mode = #tpu.pipeline_mode<synchronous>, transform_indices = @transform_3, window_bounds = array<i64: 32, 8>}, {pipeline_mode = #tpu.pipeline_mode<synchronous>, transform_indices = @transform_4, window_bounds = array<i64: 32, 1>}, {pipeline_mode = #tpu.pipeline_mode<synchronous>, transform_indices = @transform_5, window_bounds = array<i64: 32, 9>}, {pipeline_mode = #tpu.pipeline_mode<synchronous>, transform_indices = @transform_6, window_bounds = array<i64: 32, 1>}, {pipeline_mode = #tpu.pipeline_mode<synchronous>, transform_indices = @transform_7, window_bounds = array<i64: 32, 2>}, {pipeline_mode = #tpu.pipeline_mode<synchronous>, transform_indices = @transform_8, window_bounds = array<i64: 1, 2>}, {pipeline_mode = #tpu.pipeline_mode<synchronous>, transform_indices = @transform_9, window_bounds = array<i64: 32, 2>}, {pipeline_mode = #tpu.pipeline_mode<synchronous>, transform_indices = @transform_10, window_bounds = array<i64: 32, 1>}, {pipeline_mode = #tpu.pipeline_mode<synchronous>, transform_indices = @transform_11, window_bounds = array<i64: 8, 32>}, {pipeline_mode = #tpu.pipeline_mode<synchronous>, transform_indices = @transform_12, window_bounds = array<i64: 8, 1>}, {transform_indices = @transform_13, window_bounds = array<i64: 1, 8, 384>}]} {
    %c0 = arith.constant 0 : index
    %c0_0 = arith.constant 0 : index
    %0 = vector.load %arg4[%c0, %c0_0] : memref<32x8xf32, #tpu.memory_space<vmem>>, vector<32x8xf32>
    %c0_1 = arith.constant 0 : index
    %c0_2 = arith.constant 0 : index
    %c0_3 = arith.constant 0 : index
    %1 = vector.load %arg1[%c0_1, %c0_2, %c0_3] : memref<1x8x384xf32, #tpu.memory_space<vmem>>, vector<1x8x384xf32>
    %2 = vector.shape_cast %1 : vector<1x8x384xf32> to vector<8x384xf32>
    %cst = arith.constant dense<0.000000e+00> : vector<32x384xf32>
    %3 = tpu.matmul %0, %2, %cst {dimension_numbers = #tpu.dot_dimension_numbers<[1], [0], [0], [1], [0, 0, 1, 1], [], []>} : vector<32x8xf32>, vector<8x384xf32>, vector<32x384xf32> -> vector<32x384xf32>
    %c0_4 = arith.constant 0 : index
    %c0_5 = arith.constant 0 : index
    %4 = vector.load %arg5[%c0_4, %c0_5] : memref<32x1xf32, #tpu.memory_space<vmem>>, vector<32x1xf32>
    %5 = vector.broadcast %4 : vector<32x1xf32> to vector<32x384xf32>
    %6 = arith.addf %3, %5 : vector<32x384xf32>
    %7 = arith.negf %6 : vector<32x384xf32>
    %8 = math.exp %7 : vector<32x384xf32>
    %cst_6 = arith.constant 1.000000e+00 : f32
    %9 = vector.broadcast %cst_6 : f32 to vector<32x384xf32>
    %10 = arith.addf %9, %8 : vector<32x384xf32>
    %11 = arith.divf %9, %10 : vector<32x384xf32>
    %12 = arith.mulf %6, %11 : vector<32x384xf32>
    %c0_7 = arith.constant 0 : index
    %c0_8 = arith.constant 0 : index
    %13 = vector.load %arg2[%c0_7, %c0_8] : memref<1x384xf32, #tpu.memory_space<vmem>>, vector<1x384xf32>
    %14 = vector.broadcast %13 : vector<1x384xf32> to vector<32x384xf32>
    %15 = arith.mulf %12, %14 : vector<32x384xf32>
    %c0_9 = arith.constant 0 : index
    %c0_10 = arith.constant 0 : index
    %16 = vector.load %arg6[%c0_9, %c0_10] : memref<32x9xf32, #tpu.memory_space<vmem>>, vector<32x1xf32>
    %17 = vector.broadcast %16 : vector<32x1xf32> to vector<32x384xf32>
    %18 = arith.mulf %15, %17 : vector<32x384xf32>
    %c383_i32 = arith.constant 383 : i32
    %19 = tpu.dynamic_rotate %15 by %c383_i32 dim 1 : vector<32x384xf32>, i32 -> vector<32x384xf32>
    %c0_11 = arith.constant 0 : index
    %c1 = arith.constant 1 : index
    %20 = vector.load %arg6[%c0_11, %c1] : memref<32x9xf32, #tpu.memory_space<vmem>>, vector<32x1xf32>
    %21 = vector.broadcast %20 : vector<32x1xf32> to vector<32x384xf32>
    %22 = arith.mulf %19, %21 : vector<32x384xf32>
    %23 = arith.addf %18, %22 : vector<32x384xf32>
    %c382_i32 = arith.constant 382 : i32
    %24 = tpu.dynamic_rotate %15 by %c382_i32 dim 1 : vector<32x384xf32>, i32 -> vector<32x384xf32>
    %c0_12 = arith.constant 0 : index
    %c2 = arith.constant 2 : index
    %25 = vector.load %arg6[%c0_12, %c2] : memref<32x9xf32, #tpu.memory_space<vmem>>, vector<32x1xf32>
    %26 = vector.broadcast %25 : vector<32x1xf32> to vector<32x384xf32>
    %27 = arith.mulf %24, %26 : vector<32x384xf32>
    %28 = arith.addf %23, %27 : vector<32x384xf32>
    %c366_i32 = arith.constant 366 : i32
    %29 = tpu.dynamic_rotate %15 by %c366_i32 dim 1 : vector<32x384xf32>, i32 -> vector<32x384xf32>
    %c0_13 = arith.constant 0 : index
    %c3 = arith.constant 3 : index
    %30 = vector.load %arg6[%c0_13, %c3] : memref<32x9xf32, #tpu.memory_space<vmem>>, vector<32x1xf32>
    %31 = vector.broadcast %30 : vector<32x1xf32> to vector<32x384xf32>
    %32 = arith.mulf %29, %31 : vector<32x384xf32>
    %33 = arith.addf %28, %32 : vector<32x384xf32>
    %c365_i32 = arith.constant 365 : i32
    %34 = tpu.dynamic_rotate %15 by %c365_i32 dim 1 : vector<32x384xf32>, i32 -> vector<32x384xf32>
    %c0_14 = arith.constant 0 : index
    %c4 = arith.constant 4 : index
    %35 = vector.load %arg6[%c0_14, %c4] : memref<32x9xf32, #tpu.memory_space<vmem>>, vector<32x1xf32>
    %36 = vector.broadcast %35 : vector<32x1xf32> to vector<32x384xf32>
    %37 = arith.mulf %34, %36 : vector<32x384xf32>
    %38 = arith.addf %33, %37 : vector<32x384xf32>
    %c364_i32 = arith.constant 364 : i32
    %39 = tpu.dynamic_rotate %15 by %c364_i32 dim 1 : vector<32x384xf32>, i32 -> vector<32x384xf32>
    %c0_15 = arith.constant 0 : index
    %c5 = arith.constant 5 : index
    %40 = vector.load %arg6[%c0_15, %c5] : memref<32x9xf32, #tpu.memory_space<vmem>>, vector<32x1xf32>
    %41 = vector.broadcast %40 : vector<32x1xf32> to vector<32x384xf32>
    %42 = arith.mulf %39, %41 : vector<32x384xf32>
    %43 = arith.addf %38, %42 : vector<32x384xf32>
    %c348_i32 = arith.constant 348 : i32
    %44 = tpu.dynamic_rotate %15 by %c348_i32 dim 1 : vector<32x384xf32>, i32 -> vector<32x384xf32>
    %c0_16 = arith.constant 0 : index
    %c6 = arith.constant 6 : index
    %45 = vector.load %arg6[%c0_16, %c6] : memref<32x9xf32, #tpu.memory_space<vmem>>, vector<32x1xf32>
    %46 = vector.broadcast %45 : vector<32x1xf32> to vector<32x384xf32>
    %47 = arith.mulf %44, %46 : vector<32x384xf32>
    %48 = arith.addf %43, %47 : vector<32x384xf32>
    %c347_i32 = arith.constant 347 : i32
    %49 = tpu.dynamic_rotate %15 by %c347_i32 dim 1 : vector<32x384xf32>, i32 -> vector<32x384xf32>
    %c0_17 = arith.constant 0 : index
    %c7 = arith.constant 7 : index
    %50 = vector.load %arg6[%c0_17, %c7] : memref<32x9xf32, #tpu.memory_space<vmem>>, vector<32x1xf32>
    %51 = vector.broadcast %50 : vector<32x1xf32> to vector<32x384xf32>
    %52 = arith.mulf %49, %51 : vector<32x384xf32>
    %53 = arith.addf %48, %52 : vector<32x384xf32>
    %c346_i32 = arith.constant 346 : i32
    %54 = tpu.dynamic_rotate %15 by %c346_i32 dim 1 : vector<32x384xf32>, i32 -> vector<32x384xf32>
    %c0_18 = arith.constant 0 : index
    %c8 = arith.constant 8 : index
    %55 = vector.load %arg6[%c0_18, %c8] : memref<32x9xf32, #tpu.memory_space<vmem>>, vector<32x1xf32>
    %56 = vector.broadcast %55 : vector<32x1xf32> to vector<32x384xf32>
    %57 = arith.mulf %54, %56 : vector<32x384xf32>
    %58 = arith.addf %53, %57 : vector<32x384xf32>
    %c0_19 = arith.constant 0 : index
    %c0_20 = arith.constant 0 : index
    %59 = vector.load %arg7[%c0_19, %c0_20] : memref<32x1xf32, #tpu.memory_space<vmem>>, vector<32x1xf32>
    %60 = vector.broadcast %59 : vector<32x1xf32> to vector<32x384xf32>
    %61 = arith.addf %58, %60 : vector<32x384xf32>
    %62 = arith.negf %61 : vector<32x384xf32>
    %63 = math.exp %62 : vector<32x384xf32>
    %cst_21 = arith.constant 1.000000e+00 : f32
    %64 = vector.broadcast %cst_21 : f32 to vector<32x384xf32>
    %65 = arith.addf %64, %63 : vector<32x384xf32>
    %66 = arith.divf %64, %65 : vector<32x384xf32>
    %67 = arith.mulf %61, %66 : vector<32x384xf32>
    %c0_22 = arith.constant 0 : index
    %c0_23 = arith.constant 0 : index
    %68 = vector.load %arg3[%c0_22, %c0_23] : memref<1x384xf32, #tpu.memory_space<vmem>>, vector<1x384xf32>
    %69 = vector.broadcast %68 : vector<1x384xf32> to vector<32x384xf32>
    %70 = arith.mulf %67, %69 : vector<32x384xf32>
    %cst_24 = arith.constant dense<0.000000e+00> : vector<32xf32>
    %71 = vector.multi_reduction <add>, %70, %cst_24 [1] : vector<32x384xf32> to vector<32xf32>
    %72 = vector.shape_cast %71 : vector<32xf32> to vector<32x1xf32>
    %cst_25 = arith.constant 3.906250e-03 : f32
    %73 = vector.broadcast %cst_25 : f32 to vector<32x1xf32>
    %74 = arith.mulf %72, %73 : vector<32x1xf32>
    %c0_26 = arith.constant 0 : index
    %c0_27 = arith.constant 0 : index
    %75 = vector.load %arg8[%c0_26, %c0_27] : memref<32x2xf32, #tpu.memory_space<vmem>>, vector<32x2xf32>
    %76 = vector.broadcast %74 : vector<32x1xf32> to vector<32x2xf32>
    %77 = arith.mulf %75, %76 : vector<32x2xf32>
    %cst_28 = arith.constant dense<0.000000e+00> : vector<2xf32>
    %78 = vector.multi_reduction <add>, %77, %cst_28 [0] : vector<32x2xf32> to vector<2xf32>
    %79 = vector.shape_cast %78 : vector<2xf32> to vector<1x2xf32>
    %c0_29 = arith.constant 0 : index
    %c0_30 = arith.constant 0 : index
    %80 = vector.load %arg9[%c0_29, %c0_30] : memref<1x2xf32, #tpu.memory_space<vmem>>, vector<1x2xf32>
    %81 = arith.addf %79, %80 : vector<1x2xf32>
    %82 = arith.negf %81 : vector<1x2xf32>
    %83 = math.exp %82 : vector<1x2xf32>
    %cst_31 = arith.constant 1.000000e+00 : f32
    %84 = vector.broadcast %cst_31 : f32 to vector<1x2xf32>
    %85 = arith.addf %84, %83 : vector<1x2xf32>
    %86 = arith.divf %84, %85 : vector<1x2xf32>
    %87 = arith.mulf %81, %86 : vector<1x2xf32>
    %c0_32 = arith.constant 0 : index
    %c0_33 = arith.constant 0 : index
    %88 = vector.load %arg10[%c0_32, %c0_33] : memref<32x2xf32, #tpu.memory_space<vmem>>, vector<32x2xf32>
    %89 = vector.broadcast %87 : vector<1x2xf32> to vector<32x2xf32>
    %90 = arith.mulf %88, %89 : vector<32x2xf32>
    %cst_34 = arith.constant dense<0.000000e+00> : vector<32xf32>
    %91 = vector.multi_reduction <add>, %90, %cst_34 [1] : vector<32x2xf32> to vector<32xf32>
    %92 = vector.shape_cast %91 : vector<32xf32> to vector<32x1xf32>
    %c0_35 = arith.constant 0 : index
    %c0_36 = arith.constant 0 : index
    %93 = vector.load %arg11[%c0_35, %c0_36] : memref<32x1xf32, #tpu.memory_space<vmem>>, vector<32x1xf32>
    %94 = arith.addf %92, %93 : vector<32x1xf32>
    %95 = arith.negf %94 : vector<32x1xf32>
    %96 = math.exp %95 : vector<32x1xf32>
    %cst_37 = arith.constant 1.000000e+00 : f32
    %97 = vector.broadcast %cst_37 : f32 to vector<32x1xf32>
    %98 = arith.addf %97, %96 : vector<32x1xf32>
    %99 = arith.divf %97, %98 : vector<32x1xf32>
    %100 = vector.broadcast %99 : vector<32x1xf32> to vector<32x384xf32>
    %101 = arith.mulf %67, %100 : vector<32x384xf32>
    %c0_38 = arith.constant 0 : index
    %c0_39 = arith.constant 0 : index
    %102 = vector.load %arg12[%c0_38, %c0_39] : memref<8x32xf32, #tpu.memory_space<vmem>>, vector<8x32xf32>
    %cst_40 = arith.constant dense<0.000000e+00> : vector<8x384xf32>
    %103 = tpu.matmul %102, %101, %cst_40 {dimension_numbers = #tpu.dot_dimension_numbers<[1], [0], [0], [1], [0, 0, 1, 1], [], []>} : vector<8x32xf32>, vector<32x384xf32>, vector<8x384xf32> -> vector<8x384xf32>
    %c0_41 = arith.constant 0 : index
    %c0_42 = arith.constant 0 : index
    %104 = vector.load %arg13[%c0_41, %c0_42] : memref<8x1xf32, #tpu.memory_space<vmem>>, vector<8x1xf32>
    %105 = vector.broadcast %104 : vector<8x1xf32> to vector<8x384xf32>
    %106 = arith.addf %103, %105 : vector<8x384xf32>
    %c0_43 = arith.constant 0 : index
    %c0_44 = arith.constant 0 : index
    %c0_45 = arith.constant 0 : index
    %107 = vector.load %arg1[%c0_43, %c0_44, %c0_45] : memref<1x8x384xf32, #tpu.memory_space<vmem>>, vector<1x8x384xf32>
    %108 = vector.shape_cast %107 : vector<1x8x384xf32> to vector<8x384xf32>
    %c365_i32_46 = arith.constant 365 : i32
    %109 = tpu.dynamic_rotate %108 by %c365_i32_46 dim 1 : vector<8x384xf32>, i32 -> vector<8x384xf32>
    %110 = arith.addf %106, %109 : vector<8x384xf32>
    %c0_47 = arith.constant 0 : index
    %c0_48 = arith.constant 0 : index
    %c0_49 = arith.constant 0 : index
    %111 = vector.load %arg14[%c0_47, %c0_48, %c0_49] : memref<1x8x384xf32, #tpu.memory_space<vmem>>, vector<1x8x384xf32>
    %112 = vector.shape_cast %111 : vector<1x8x384xf32> to vector<8x384xf32>
    %113 = vector.shape_cast %110 : vector<8x384xf32> to vector<1x8x384xf32>
    tpu.vector_store %arg14[%c0_47, %c0_48, %c0_49], %113 {strides = array<i32>} : memref<1x8x384xf32, #tpu.memory_space<vmem>>, vector<1x8x384xf32>,
    return
  }
  func.func @transform_0(%arg0: i32) -> (i32, i32, i32) {
    %c0_i32 = arith.constant 0 : i32
    %c0_i32_0 = arith.constant 0 : i32
    %c0_i32_1 = arith.constant 0 : i32
    return %arg0, %c0_i32, %c0_i32_0 : i32, i32, i32
  }
  func.func @transform_1(%arg0: i32) -> (i32, i32) {
    %c0_i32 = arith.constant 0 : i32
    %c0_i32_0 = arith.constant 0 : i32
    %c0_i32_1 = arith.constant 0 : i32
    return %c0_i32, %c0_i32_0 : i32, i32
  }
  func.func @transform_2(%arg0: i32) -> (i32, i32) {
    %c0_i32 = arith.constant 0 : i32
    %c0_i32_0 = arith.constant 0 : i32
    %c0_i32_1 = arith.constant 0 : i32
    return %c0_i32, %c0_i32_0 : i32, i32
  }
  func.func @transform_3(%arg0: i32) -> (i32, i32) {
    %c0_i32 = arith.constant 0 : i32
    %c0_i32_0 = arith.constant 0 : i32
    %c0_i32_1 = arith.constant 0 : i32
    return %c0_i32, %c0_i32_0 : i32, i32
  }
  func.func @transform_4(%arg0: i32) -> (i32, i32) {
    %c0_i32 = arith.constant 0 : i32
    %c0_i32_0 = arith.constant 0 : i32
    %c0_i32_1 = arith.constant 0 : i32
    return %c0_i32, %c0_i32_0 : i32, i32
  }
  func.func @transform_5(%arg0: i32) -> (i32, i32) {
    %c0_i32 = arith.constant 0 : i32
    %c0_i32_0 = arith.constant 0 : i32
    %c0_i32_1 = arith.constant 0 : i32
    return %c0_i32, %c0_i32_0 : i32, i32
  }
  func.func @transform_6(%arg0: i32) -> (i32, i32) {
    %c0_i32 = arith.constant 0 : i32
    %c0_i32_0 = arith.constant 0 : i32
    %c0_i32_1 = arith.constant 0 : i32
    return %c0_i32, %c0_i32_0 : i32, i32
  }
  func.func @transform_7(%arg0: i32) -> (i32, i32) {
    %c0_i32 = arith.constant 0 : i32
    %c0_i32_0 = arith.constant 0 : i32
    %c0_i32_1 = arith.constant 0 : i32
    return %c0_i32, %c0_i32_0 : i32, i32
  }
  func.func @transform_8(%arg0: i32) -> (i32, i32) {
    %c0_i32 = arith.constant 0 : i32
    %c0_i32_0 = arith.constant 0 : i32
    %c0_i32_1 = arith.constant 0 : i32
    return %c0_i32, %c0_i32_0 : i32, i32
  }
  func.func @transform_9(%arg0: i32) -> (i32, i32) {
    %c0_i32 = arith.constant 0 : i32
    %c0_i32_0 = arith.constant 0 : i32
    %c0_i32_1 = arith.constant 0 : i32
    return %c0_i32, %c0_i32_0 : i32, i32
  }
  func.func @transform_10(%arg0: i32) -> (i32, i32) {
    %c0_i32 = arith.constant 0 : i32
    %c0_i32_0 = arith.constant 0 : i32
    %c0_i32_1 = arith.constant 0 : i32
    return %c0_i32, %c0_i32_0 : i32, i32
  }
  func.func @transform_11(%arg0: i32) -> (i32, i32) {
    %c0_i32 = arith.constant 0 : i32
    %c0_i32_0 = arith.constant 0 : i32
    %c0_i32_1 = arith.constant 0 : i32
    return %c0_i32, %c0_i32_0 : i32, i32
  }
  func.func @transform_12(%arg0: i32) -> (i32, i32) {
    %c0_i32 = arith.constant 0 : i32
    %c0_i32_0 = arith.constant 0 : i32
    %c0_i32_1 = arith.constant 0 : i32
    return %c0_i32, %c0_i32_0 : i32, i32
  }
  func.func @transform_13(%arg0: i32) -> (i32, i32, i32) {
    %c0_i32 = arith.constant 0 : i32
    %c0_i32_0 = arith.constant 0 : i32
    %c0_i32_1 = arith.constant 0 : i32
    return %arg0, %c0_i32, %c0_i32_0 : i32, i32, i32
  }
}

</mosaic_0001>

<bundles_post_ra>
// kernel: bmconv_block_forward.1
= control target key start
LH: loop header
LB: loop body
LE: loop exit
PB: predicated region body
PF: predicated region fallthrough
CT: control target
= control target key end

     0   :  { %s2298_s25 = smov 0   ;;  %s3577_s0 = inlined_call_operand.vmem [shape: f32[2,8,384], index: 0, kind: input, shape index: {}]   ;;  %s3578_s1 = inlined_call_operand.vmem [shape: f32[1,384], index: 1, kind: input, shape index: {}]   ;;  %s3579_s2 = inlined_call_operand.vmem [shape: f32[1,384], index: 2, kind: input, shape index: {}]   ;;  %s3580_s3 = inlined_call_operand.vmem [shape: f32[32,8], index: 3, kind: input, shape index: {}]   ;;  %s3581_s4 = inlined_call_operand.vmem [shape: f32[32,1], index: 4, kind: input, shape index: {}]   ;;  %s3582_s5 = inlined_call_operand.vmem [shape: f32[32,9], index: 5, kind: input, shape index: {}]   ;;  %s3583_s6 = inlined_call_operand.vmem [shape: f32[32,1], index: 6, kind: input, shape index: {}]   ;;  %s3584_s7 = inlined_call_operand.vmem [shape: f32[32,2], index: 7, kind: input, shape index: {}]   ;;  %s3585_s8 = inlined_call_operand.vmem [shape: f32[1,2], index: 8, kind: input, shape index: {}]   ;;  %s3586_s9 = inlined_call_operand.vmem [shape: f32[32,2], index: 9, kind: input, shape index: {}]   ;;  %s3587_s10 = inlined_call_operand.vmem [shape: f32[32,1], index: 10, kind: input, shape index: {}]   ;;  %s3588_s11 = inlined_call_operand.vmem [shape: f32[8,32], index: 11, kind: input, shape index: {}]   ;;  %s3589_s12 = inlined_call_operand.vmem [shape: f32[8,1], index: 12, kind: input, shape index: {}]   ;;  %s3590_s13 = inlined_call_operand.vmem [shape: f32[2,8,384], index: 13, kind: output, shape index: {}]  }
   0x1 LB: > { %s1936_s26 = sadd.s32 4294967295, %s2206_s25   ;;  %p1940_p0 = scmp.ge.s32.totalorder %s2206_s25, 1  ;;  %s2206_s25 = sphi %s2298_s25, %s23_s25  }
   0x2   : > { %p387_p1 = scmp.lt.s32.totalorder %s2206_s25, 3 }
   0x4   : > { %p388_p2 = pnand %p1940_p0, %p387_p1 }
   0x6   : > { %391 = sbr.rel (%p388_p2) target bundleno = 1380 (0x564), region = 72 }
   0xd   : > { %p431_p3 = scmp.lt.s32.totalorder %s1936_s26, 1  ;;  %v2309_v0 = vld [vmem:[%s3582_s5] sm:$0xff]  ;;  %v2208_v1 = vmov 1   ;;  %v3591_v2 = vmov 0.0   ;;  %v2320_v3 = vld [vmem:[%s3582_s5 + $0x10] sm:$0xff]  ;;  %v2210_v5 = vmov 0  }
   0xe   : > { %2059 = vset.pattern.permute.xlu0 %v2208_v1  ;;  %549 = vmatprep.mubr.f32.mxu0 %v3591_v2  ;;  %v450_v4 = vld [vmem:[%s3581_s4 + $0x10] sm:$0xff]  ;;  %v441_v6 = vld [vmem:[%s3580_s3] sm:$0xff]  ;;  %vm472_vm0 = vcmask 64512   ;;  %v444_v9 = vld [vmem:[%s3580_s3 + $0x18] sm:$0xff]  ;;  %v2211_v14 = vmov 3   ;;  %v2212_v16 = vmov 2  }
   0xf   : > { %s3737_s26 = smov (!%p431_p3, %s1936_s26), 1  ;;  %567 = vmatprep.mubr.f32.mxu1 %v3591_v2  ;;  %848 = vperm.xlu0 %2059, %v2309_v0   ;;  %v451_v11 = vld [vmem:[%s3581_s4 + $0x18] sm:$0xff]  ;;  %v442_v12 = vld [vmem:[%s3580_s3 + $0x8] sm:$0xff]  ;;  %v443_v13 = vld [vmem:[%s3580_s3 + $0x10] sm:$0xff]  ;;  %v2213_v18 = vmov 4   ;;  %v2214_v19 = vmov 5  }
  0x10   : > { %s2029_s16 = smul.u32 24, %s3737_s26  ;;  %2058 = vset.pattern.permute.xlu1 %v2210_v5  ;;  %v773_v15 = vld [vmem:[%s3582_s5 + $0x8] sm:$0xff]  ;;  %v775_v17 = vld [vmem:[%s3582_s5 + $0x18] sm:$0xff]  ;;  %v2215_v20 = vmov 6   ;;  %v2216_v21 = vmov 8   ;;  %v2217_v22 = vmov 7  }
  0x11   : > { %464 = vperm.xlu1 %2058, %v450_v4   ;;  %v448_v23 = vld [vmem:[%s3581_s4] sm:$0xff]  ;;  %v449_v24 = vld [vmem:[%s3581_s4 + $0x8] sm:$0xff]  ;;  %s2218_s17 = smov 110   ;;  %s2219_s18 = smov 127   ;;  %vm1603_vm9 = vcmask 15360   ;;  %vm2227_vm10 = vmmov 0  }
  0x12   : > { %s2332_s19 = scalar_lea.vmem %s3577_s0, %s2029_s16  ;;  %v1426_v25 = vld [vmem:[%s3583_s6] sm:$0xff]  ;;  %v1427_v26 = vld [vmem:[%s3583_s6 + $0x8] sm:$0xff]  ;;  %s2220_s20 = smov 109   ;;  %vm1721_vm11 = vcmask 261120  }
  0x13   : > { %856 = vperm.xlu0 %2059, %v2320_v3   ;;  %v446_v7 = vld [vmem:[%s2332_s19 + $0x8] sm:$0xff]  ;;  %v445_v8 = vld [vmem:[%s2332_s19] sm:$0xff]  ;;  %v447_v10 = vld [vmem:[%s2332_s19 + $0x10] sm:$0xff]  ;;  %s2221_s21 = smov 126   ;;  %s2222_s22 = smov 108  }
  0x14   : > { %485 = vmatprep.subr.mxu0 %v446_v7  ;;  %2027 = vmatprep.subr.mxu1 %v446_v7  ;;  %s2223_s23 = smov 92   ;;  %s2224_s24 = smov 91  }
  0x15   : > { %486 = vmatpush1.msra.mxu0 %v445_v8  ;;  %2028 = vmatpush1.msra.mxu1 %v445_v8  ;;  %s2225_s27 = smov 90   ;;  %s440_s28 = scalar_lea.vmem %s3590_s13, %s2029_s16 }
  0x16   : > { %1943 = vmatmul.mubr.msk.f32.vlgmr.msra.gmra.mrb[0].mxu0 %vm472_vm0, %v441_v6  ;;  %1946 = vmatmul.mubr.msk.f32.vlgmr.msra.gmra.mrb[0].mxu1 %vm472_vm0, %v444_v9 }
  0x17   : > { %1994 = vmatprep.subr.mxu1 %v447_v10  ;;  %555 = vmatprep.mubr.f32.mxu0 %v3591_v2 }
  0x18   : > { %1995 = vmatpush3.msra.mxu1 %v447_v10  ;;  %1996 = vmatprep.mubr.msk.f32.mxu1 %vm472_vm0, %v441_v6  ;;  %v3594_v6 = vlaneseq }
  0x19   : > { %2066 = vset.pattern.permute.xlu0 %v2211_v14  ;;  %469 = vperm.xlu1 %2058, %v451_v11  }
  0x1a   : > { %1944 = vmatmul.mubr.msk.f32.gmra.mrb[2].mxu0 %vm472_vm0, %v442_v12  ;;  %1997 = vmatmul.mubr.msk.f32.vlgmr.msra.gmra.mrb[2].mxu1 %vm472_vm0, %v442_v12  ;;  %v2459_v10 = vshrl.u32 %v3594_v6, 7 }
  0x1b   : > { %561 = vmatprep.mubr.f32.mxu0 %v3591_v2  ;;  %1999 = vmatprep.mubr.msk.f32.mxu1 %vm472_vm0, %v443_v13 }
  0x1c   : > { %1006 = vperm.xlu0 %2066, %v773_v15   ;;  %3650 = vst [vmem:[#allocation10_spill] sm:$0xff] %v2459_v10 }
  0x1d   : > { %783 = vperm.xlu1 %2058, %v773_v15  }
  0x1e   : > { %1945 = vmatmul.mubr.msk.f32.gmra.mrb[4].mxu0 %vm472_vm0, %v443_v13  ;;  %2000 = vmatmul.mubr.msk.f32.gmra.mrb[4].mxu1 %vm472_vm0, %v444_v9  ;;  %v2462_v13 = vsub.s32 0, %v2459_v10 }
  0x1f   : > { %1789 = vmatprep.mubr.f32.mxu1 %v3591_v2 }
  0x20   : > { %2067 = vset.pattern.permute.xlu0 %v2212_v16  ;;  %3651 = vst [vmem:[#allocation11_spill] sm:$0xff] %v2462_v13 }
  0x21   : > { %929 = vperm.xlu0 %2067, %v773_v15   ;;  %2060 = vset.pattern.permute.xlu1 %v2208_v1 }
  0x22   : > { %852 = vperm.xlu1 %2060, %v773_v15  }
  0x25   : > { %933 = vperm.xlu0 %2067, %v2320_v3  }
  0x26   : > { %2061 = vset.pattern.permute.xlu1 %v2210_v5 }
  0x27   : > { %788 = vperm.xlu1 %2061, %v2320_v3  }
  0x29   : > { %937 = vperm.xlu0 %2067, %v775_v17  }
  0x2b   : > { %2062 = vset.pattern.permute.xlu1 %v2212_v16 }
  0x2c   : > { %925 = vperm.xlu1 %2062, %v2309_v0  }
  0x2d   : > { %2069 = vset.pattern.permute.xlu0 %v2213_v18 }
  0x2e   : > { %1083 = vperm.xlu0 %2069, %v773_v15  }
  0x30   : > { %2063 = vset.pattern.permute.xlu1 %v2210_v5 }
  0x31   : > { %793 = vperm.xlu1 %2063, %v775_v17  }
  0x32   : > { %1087 = vperm.xlu0 %2069, %v2320_v3  }
  0x35   : > { %2064 = vset.pattern.permute.xlu1 %v2208_v1 }
  0x36   : > { %1091 = vperm.xlu0 %2069, %v775_v17   ;;  %860 = vperm.xlu1 %2064, %v775_v17  }
  0x3a   : > { %2072 = vset.pattern.permute.xlu0 %v2214_v19  ;;  %2065 = vset.pattern.permute.xlu1 %v2211_v14 }
  0x3b   : > { %1160 = vperm.xlu0 %2072, %v773_v15   ;;  %1002 = vperm.xlu1 %2065, %v2309_v0  }
  0x3f   : > { %1168 = vperm.xlu0 %2072, %v775_v17   ;;  %1010 = vperm.xlu1 %2065, %v2320_v3  }
  0x43   : > { %2074 = vset.pattern.permute.xlu0 %v2215_v20  ;;  %2068 = vset.pattern.permute.xlu1 %v2213_v18 }
  0x44   : > { %1237 = vperm.xlu0 %2074, %v773_v15   ;;  %1079 = vperm.xlu1 %2068, %v2309_v0  }
  0x48   : > { %1245 = vperm.xlu0 %2074, %v775_v17   ;;  %2070 = vset.pattern.permute.xlu1 %v2211_v14  ;;  %v2467_v14 = vld [vmem:[%s3578_s1] sm:$0x7] }
  0x49   : > { %1014 = vperm.xlu1 %2070, %v775_v17  }
  0x4c   : > { %2077 = vset.pattern.permute.xlu0 %v2216_v21 }
  0x4d   : > { %1391 = vperm.xlu0 %2077, %v773_v15   ;;  %2071 = vset.pattern.permute.xlu1 %v2214_v19 }
  0x4e   : > { %1156 = vperm.xlu1 %2071, %v2309_v0  }
  0x51   : > { %2078 = vset.pattern.permute.xlu0 %v2217_v22 }
  0x52   : > { %1314 = vperm.xlu0 %2078, %v773_v15   ;;  %1164 = vperm.xlu1 %2071, %v2320_v3  }
  0x56   : > { %1322 = vperm.xlu0 %2078, %v775_v17   ;;  %2073 = vset.pattern.permute.xlu1 %v2215_v20  ;;  %v2474_v20 = vrot.slane %v2467_v14, %v2462_v13 }
  0x57   : > { %1233 = vperm.xlu1 %2073, %v2309_v0  }
  0x5a   : > { %2079 = vset.pattern.permute.xlu0 %v2210_v5 }
  0x5b   : > { %454 = vperm.xlu0 %2079, %v448_v23   ;;  %1241 = vperm.xlu1 %2073, %v2320_v3  }
  0x5f   : > { %459 = vperm.xlu0 %2079, %v449_v24   ;;  %2075 = vset.pattern.permute.xlu1 %v2217_v22 }
  0x60   : > { %1310 = vperm.xlu1 %2075, %v2309_v0  }
  0x63   : > { %778 = vperm.xlu0 %2079, %v2309_v0  }
  0x64   : > { %1318 = vperm.xlu1 %2075, %v2320_v3  }
  0x67   : > { %1432 = vperm.xlu0 %2079, %v1426_v25  }
  0x68   : > { %2076 = vset.pattern.permute.xlu1 %v2216_v21 }
  0x69   : > { %1387 = vperm.xlu1 %2076, %v2309_v0  }
  0x6d   : > { %1395 = vperm.xlu1 %2076, %v2320_v3  }
  0x71   : > { %1399 = vperm.xlu1 %2076, %v775_v17  }
  0x75   : > { %2080 = vset.pattern.permute.xlu1 %v2210_v5 }
  0x76   : > { %1437 = vperm.xlu1 %2080, %v1427_v26  }
  0x8e   : > { %v2404_v27 = vpop.permute.xlu0 %848 }
  0x90   : > { %v2434_v42 = vpop.permute.xlu1 %464 }
  0x92   : > { %v2406_v28 = vpop.permute.xlu0 %856 }
  0x93   : > { %3642 = vst [vmem:[#allocation2_spill] sm:$0xff] %v2406_v28 }
  0x98   : > { %v2438_v44 = vpop.permute.xlu1 %469 }
  0x9b   : > { %v2408_v29 = vpop.permute.xlu0 %1006 }
  0xa0   : > { %v2410_v30 = vpop.permute.xlu0 %929 }
  0xa4   : > { %v2412_v31 = vpop.permute.xlu0 %933 }
  0xa5   : > { %3643 = vst [vmem:[#allocation3_spill] sm:$0xff] %v2412_v31 }
  0xa8   : > { %v2414_v32 = vpop.permute.xlu0 %937 }
  0xad   : > { %v2416_v33 = vpop.permute.xlu0 %1083 }
  0xae   : > { %3644 = vst [vmem:[#allocation4_spill] sm:$0xff] %v2416_v33 }
  0xb1   : > { %v2418_v34 = vpop.permute.xlu0 %1087 }
  0xb2   : > { %3645 = vst [vmem:[#allocation5_spill] sm:$0xff] %v2418_v34 }
  0xb5   : > { %v2420_v35 = vpop.permute.xlu0 %1091 }
  0xba   : > { %v2422_v36 = vpop.permute.xlu0 %1160 }
  0xbe   : > { %v2424_v37 = vpop.permute.xlu0 %1168 }
  0xbf   : > { %3646 = vst [vmem:[#allocation6_spill] sm:$0xff] %v2424_v37 }
  0xc3   : > { %v2426_v38 = vpop.permute.xlu0 %1237 }
  0xc7   : > { %v2428_v39 = vpop.permute.xlu0 %1245 }
  0xc8   : > { %3647 = vst [vmem:[#allocation7_spill] sm:$0xff] %v2428_v39 }
  0xcc   : > { %v2430_v40 = vpop.permute.xlu0 %1391 }
  0xcd   : > { %3648 = vst [vmem:[#allocation8_spill] sm:$0xff] %v2430_v40 }
  0xd1   : > { %v2432_v41 = vpop.permute.xlu0 %1314 }
  0xd5   : > { %v2436_v43 = vpop.permute.xlu0 %1322 }
  0xd6   : > { %3649 = vst [vmem:[#allocation9_spill] sm:$0xff] %v2436_v43 }
  0xda   : > { %v2440_v45 = vpop.permute.xlu0 %454 }
  0xde   : > { %v460_v22 = vpop.permute.xlu0 %459 }
  0xe9   : > { %v551_v46 = vpop.f32.mrb[0].mxu0  ;;  %v569_v47 = vpop.f32.mrb[0].mxu1 }
  0xea   : > { %v552_v48 = vadd.f32 %v551_v46, %v2440_v45  ;;  %v570_v49 = vadd.f32 %v569_v47, %v2438_v44  ;;  %v553_v50 = vpop.f32.mrb[1].mxu0  ;;  %v571_v51 = vpop.f32.mrb[1].mxu1 }
  0xeb   : > { %v2445_v54 = vadd.f32 %v553_v50, %v2440_v45  ;;  %v2470_v17 = vadd.f32 %v571_v51, %v2438_v44  ;;  %v2482_v46 = vpop.permute.xlu1 %783 }
  0xec   : > { %v1951_v52 = vmul.f32 -1.442695, %v552_v48  ;;  %v1960_v53 = vmul.f32 -1.442695, %v570_v49 }
  0xed   : > { %v557_v55 = vpop.f32.mrb[2].mxu0  ;;  %v1998_v56 = vpop.f32.mrb[2].mxu1  ;;  %v1952_v59 = vmul.f32 -1.442695, %v2445_v54  ;;  %v1961_v24 = vmul.f32 -1.442695, %v2470_v17 }
  0xee   : > { %2081 = vpow2.f32 %v1951_v52  ;;  %v2447_v57 = vpop.f32.mrb[3].mxu0  ;;  %v2449_v58 = vpop.f32.mrb[3].mxu1  ;;  %v2477_v25 = vadd.f32 %v557_v55, %v460_v22  ;;  %v2485_v51 = vadd.f32 %v1998_v56, %v460_v22  ;;  %v3593_v52 = vsub.s32 1, %v2459_v10 }
  0xef   : > { %2083 = vpow2.f32 %v1960_v53  ;;  %v2492_v53 = vpop.permute.xlu1 %852 }
  0xf0   : > { %2085 = vpow2.f32 %v1952_v59  ;;  %v1954_v50 = vmul.f32 -1.442695, %v2477_v25  ;;  %v1956_v59 = vmul.f32 -1.442695, %v2485_v51 }
  0xf1   : > { %v563_v60 = vpop.f32.mrb[4].mxu0  ;;  %v2452_v61 = vpop.f32.mrb[4].mxu1 }
  0xf2   : > { %v564_v62 = vadd.f32 %v563_v60, %v2434_v42  ;;  %v565_v63 = vpop.f32.mrb[5].mxu0  ;;  %v2455_v0 = vpop.f32.mrb[5].mxu1 }
  0xf3   : > { %v566_v1 = vadd.f32 %v565_v63, %v2434_v42  ;;  %v2505_v63 = vrot.slane %v2467_v14, %v3593_v52 }
  0xf4   : > { %v1957_v3 = vmul.f32 -1.442695, %v564_v62 }
  0xf5   : > { %v1958_v4 = vmul.f32 -1.442695, %v566_v1 }
  0xf6   : > { %2087 = vpow2.f32 %v1957_v3 }
  0xf7   : > { %2089 = vpow2.f32 %v1958_v4 }
  0xf8   : > { %v2082_v5 = vpop.eup %2081 }
  0xf9   : > { %v2084_v7 = vpop.eup %2083  ;;  %v695_v8 = vadd.f32 1.0, %v2082_v5 }
  0xfa   : > { %v704_v9 = vadd.f32 1.0, %v2084_v7  ;;  %v2086_v11 = vpop.eup %2085  ;;  %v2513_v7 = vpop.permute.xlu1 %788 }
  0xfb   : > { %2091 = vrcp.f32 %v695_v8  ;;  %v696_v18 = vadd.f32 1.0, %v2086_v11  ;;  %3653 = vst [vmem:[#allocation13_spill] sm:$0xff] %v2513_v7 }
  0xfc   : > { %2093 = vrcp.f32 %v704_v9 }
 0x100   : > { %v2088_v12 = vpop.eup %2087 }
 0x101   : > { %v701_v15 = vadd.f32 1.0, %v2088_v12  ;;  %v2090_v16 = vpop.eup %2089 }
 0x102   : > { %v702_v19 = vadd.f32 1.0, %v2090_v16  ;;  %v2531_v16 = vpop.permute.xlu1 %925 }
 0x103   : > { %2095 = vrcp.f32 %v701_v15  ;;  %3654 = vst [vmem:[#allocation14_spill] sm:$0xff] %v2531_v16 }
 0x104   : > { %2097 = vrcp.f32 %v702_v19 }
 0x105   : > { %v2092_v21 = vpop.eup %2091  ;;  %2099 = vrcp.f32 %v696_v18 }
 0x106   : > { %v731_v23 = vmul.f32 %v2092_v21, %v552_v48  ;;  %v2094_v47 = vpop.eup %2093  ;;  %2101 = vpow2.f32 %v1961_v24  ;;  %v2539_v21 = vpop.permute.xlu1 %793 }
 0x107   : > { %v740_v48 = vmul.f32 %v2094_v47, %v570_v49  ;;  %2103 = vpow2.f32 %v1954_v50  ;;  %3655 = vst [vmem:[#allocation15_spill] sm:$0xff] %v2539_v21 }
 0x108   : > { %v2480_v26 = vmul.f32 %v2474_v20, %v731_v23  ;;  %2105 = vpow2.f32 %v1956_v59 }
 0x109   : > { %v2500_v49 = vmul.f32 %v2474_v20, %v740_v48 }
 0x10a   : > { %964 = vrot.lane.b32.xlu0 %v2480_v26, %s2218_s17  ;;  %808 = vrot.lane.b32.xlu1 %v2480_v26, %s2219_s18 }
 0x10d   : > { %v2096_v55 = vpop.eup %2095 }
 0x10e   : > { %v737_v60 = vmul.f32 %v2096_v55, %v564_v62  ;;  %1041 = vrot.lane.b32.xlu0 %v2480_v26, %s2220_s20  ;;  %887 = vrot.lane.b32.xlu1 %v2480_v26, %s2221_s21  ;;  %v2098_v56 = vpop.eup %2097 }
 0x10f   : > { %v738_v62 = vmul.f32 %v2098_v56, %v566_v1  ;;  %v2100_v4 = vpop.eup %2099  ;;  %v2522_v1 = vadd.f32 %v2449_v58, %v2440_v45 }
 0x110   : > { %v2508_v3 = vmul.f32 %v2474_v20, %v737_v60  ;;  %v2102_v8 = vpop.eup %2101  ;;  %v732_v9 = vmul.f32 %v2100_v4, %v2445_v54  ;;  %v560_v54 = vadd.f32 %v2447_v57, %v460_v22  ;;  %v2549_v22 = vpop.permute.xlu1 %860 }
 0x111   : > { %v2511_v5 = vmul.f32 %v2505_v63, %v738_v62  ;;  %v705_v11 = vadd.f32 1.0, %v2102_v8  ;;  %v2104_v12 = vpop.eup %2103  ;;  %v1953_v18 = vmul.f32 -1.442695, %v2522_v1  ;;  %3656 = vst [vmem:[#allocation16_spill] sm:$0xff] %v2549_v22  ;;  %v3592_v62 = vsub.s32 2, %v2459_v10 }
 0x112   : > { %1118 = vrot.lane.b32.xlu0 %v2480_v26, %s2222_s22  ;;  %814 = vrot.lane.b32.xlu1 %v2500_v49, %s2219_s18  ;;  %v2529_v15 = vmul.f32 %v2505_v63, %v732_v9  ;;  %v698_v45 = vadd.f32 1.0, %v2104_v12  ;;  %v2106_v58 = vpop.eup %2105  ;;  %v1955_v19 = vmul.f32 -1.442695, %v560_v54  ;;  %v656_v12 = vadd.f32 %v2452_v61, %v2438_v44 }
 0x113   : > { %3652 = vst [vmem:[#allocation12_spill] sm:$0xff] %v2511_v5  ;;  %2107 = vrcp.f32 %v705_v11  ;;  %v700_v57 = vadd.f32 1.0, %v2106_v58 }
 0x114   : > { %2109 = vpow2.f32 %v1953_v18  ;;  %v2556_v50 = vpop.permute.xlu1 %1002 }
 0x115   : > { %2111 = vrcp.f32 %v698_v45  ;;  %3657 = vst [vmem:[#allocation17_spill] sm:$0xff] %v2556_v50 }
 0x116   : > { %1195 = vrot.lane.b32.xlu0 %v2480_v26, %s2223_s23  ;;  %893 = vrot.lane.b32.xlu1 %v2500_v49, %s2221_s21  ;;  %2113 = vpow2.f32 %v1955_v19 }
 0x117   : > { %2115 = vrcp.f32 %v700_v57 }
 0x11a   : > { %816 = vrot.lane.b32.xlu0 %v2529_v15, %s2219_s18  ;;  %970 = vrot.lane.b32.xlu1 %v2500_v49, %s2218_s17 }
 0x11d   : > { %v2108_v23 = vpop.eup %2107 }
 0x11e   : > { %972 = vrot.lane.b32.xlu0 %v2529_v15, %s2218_s17  ;;  %1047 = vrot.lane.b32.xlu1 %v2500_v49, %s2220_s20  ;;  %v2110_v24 = vpop.eup %2109  ;;  %v741_v47 = vmul.f32 %v2108_v23, %v2470_v17  ;;  %v2571_v17 = vpop.permute.xlu1 %1010 }
 0x11f   : > { %v2112_v48 = vpop.eup %2111  ;;  %v697_v55 = vadd.f32 1.0, %v2110_v24  ;;  %3658 = vst [vmem:[#allocation18_spill] sm:$0xff] %v2571_v17  ;;  %v651_v24 = vadd.f32 %v2455_v0, %v2434_v42 }
 0x120   : > { %v2114_v59 = vpop.eup %2113  ;;  %v2563_v60 = vmul.f32 %v2505_v63, %v741_v47  ;;  %v734_v56 = vmul.f32 %v2112_v48, %v2477_v25  ;;  %v2580_v25 = vrot.slane %v2467_v14, %v3592_v62 }
 0x121   : > { %v2116_v4 = vpop.eup %2115  ;;  %v699_v8 = vadd.f32 1.0, %v2114_v59  ;;  %2117 = vrcp.f32 %v697_v55  ;;  %v1959_v48 = vmul.f32 -1.442695, %v651_v24 }
 0x122   : > { %1049 = vrot.lane.b32.xlu0 %v2529_v15, %s2220_s20  ;;  %1124 = vrot.lane.b32.xlu1 %v2500_v49, %s2222_s22  ;;  %v2574_v9 = vmul.f32 %v2474_v20, %v734_v56  ;;  %v736_v11 = vmul.f32 %v2116_v4, %v2485_v51  ;;  %v2591_v18 = vpop.permute.xlu1 %1079  ;;  %v1962_v51 = vmul.f32 -1.442695, %v656_v12 }
 0x123   : > { %2119 = vrcp.f32 %v699_v8  ;;  %3659 = vst [vmem:[#allocation19_spill] sm:$0xff] %v2591_v18 }
 0x124   : > { %v2589_v20 = vmul.f32 %v2580_v25, %v736_v11  ;;  %2121 = vpow2.f32 %v1962_v51 }
 0x126   : > { %1126 = vrot.lane.b32.xlu0 %v2529_v15, %s2222_s22  ;;  %1272 = vrot.lane.b32.xlu1 %v2480_v26, %s2224_s24  ;;  %v2601_v61 = vpop.permute.xlu1 %1014 }
 0x12a   : > { %1203 = vrot.lane.b32.xlu0 %v2529_v15, %s2223_s23  ;;  %1201 = vrot.lane.b32.xlu1 %v2500_v49, %s2223_s23  ;;  %v2611_v57 = vpop.permute.xlu1 %1156 }
 0x12b   : > { %v2118_v44 = vpop.eup %2117  ;;  %3660 = vst [vmem:[#allocation20_spill] sm:$0xff] %v2611_v57 }
 0x12c   : > { %v733_v14 = vmul.f32 %v2118_v44, %v2522_v1 }
 0x12d   : > { %v2120_v45 = vpop.eup %2119 }
 0x12e   : > { %1132 = vrot.lane.b32.xlu0 %v2563_v60, %s2222_s22  ;;  %895 = vrot.lane.b32.xlu1 %v2529_v15, %s2221_s21  ;;  %v735_v58 = vmul.f32 %v2120_v45, %v560_v54  ;;  %v2609_v19 = vmul.f32 %v2580_v25, %v733_v14  ;;  %v2122_v1 = vpop.eup %2121  ;;  %v2626_v54 = vpop.permute.xlu1 %1164 }
 0x12f   : > { %3661 = vst [vmem:[#allocation21_spill] sm:$0xff] %v2626_v54  ;;  %v706_v47 = vadd.f32 1.0, %v2122_v1  ;;  %v2688_v1 = vpop.permute.xlu0 %778 }
 0x130   : > { %v2618_v23 = vmul.f32 %v2505_v63, %v735_v58 }
 0x131   : > { %2123 = vrcp.f32 %v706_v47 }
 0x132   : > { %889 = vrot.lane.b32.xlu0 %v2574_v9, %s2221_s21  ;;  %822 = vrot.lane.b32.xlu1 %v2563_v60, %s2219_s18  ;;  %v2632_v63 = vpop.permute.xlu1 %1233  ;;  %2125 = vpow2.f32 %v1959_v48 }
 0x133   : > { %3662 = vst [vmem:[#allocation22_spill] sm:$0xff] %v2632_v63 }
 0x136   : > { %905 = vrot.lane.b32.xlu0 %v2589_v20, %s2221_s21  ;;  %901 = vrot.lane.b32.xlu1 %v2563_v60, %s2221_s21  ;;  %v2642_v42 = vpop.permute.xlu1 %1241 }
 0x137   : > { %3663 = vst [vmem:[#allocation23_spill] sm:$0xff] %v2642_v42 }
 0x13a   : > { %1274 = vrot.lane.b32.xlu0 %v2574_v9, %s2224_s24  ;;  %978 = vrot.lane.b32.xlu1 %v2563_v60, %s2218_s17  ;;  %v2648_v56 = vpop.permute.xlu1 %1310 }
 0x13b   : > { %v2124_v0 = vpop.eup %2123  ;;  %3664 = vst [vmem:[#allocation24_spill] sm:$0xff] %v2648_v56 }
 0x13c   : > { %v2126_v55 = vpop.eup %2125  ;;  %v742_v59 = vmul.f32 %v2124_v0, %v656_v12 }
 0x13d   : > { %v703_v4 = vadd.f32 1.0, %v2126_v55 }
 0x13e   : > { %1290 = vrot.lane.b32.xlu0 %v2589_v20, %s2224_s24  ;;  %1055 = vrot.lane.b32.xlu1 %v2563_v60, %s2220_s20  ;;  %v2655_v8 = vmul.f32 %v2580_v25, %v742_v59  ;;  %v2661_v11 = vpop.permute.xlu1 %1318 }
 0x13f   : > { %3665 = vst [vmem:[#allocation25_spill] sm:$0xff] %v2661_v11  ;;  %2127 = vrcp.f32 %v703_v4 }
 0x142   : > { %824 = vrot.lane.b32.xlu0 %v2609_v19, %s2219_s18  ;;  %1280 = vrot.lane.b32.xlu1 %v2529_v15, %s2224_s24  ;;  %v2667_v12 = vpop.permute.xlu1 %1387 }
 0x143   : > { %3666 = vst [vmem:[#allocation26_spill] sm:$0xff] %v2667_v12 }
 0x146   : > { %897 = vrot.lane.b32.xlu0 %v2618_v23, %s2221_s21  ;;  %810 = vrot.lane.b32.xlu1 %v2574_v9, %s2219_s18  ;;  %v2677_v44 = vpop.permute.xlu1 %1395 }
 0x147   : > { %3667 = vst [vmem:[#allocation27_spill] sm:$0xff] %v2677_v44 }
 0x149   : > { %v2128_v51 = vpop.eup %2127 }
 0x14a   : > { %980 = vrot.lane.b32.xlu0 %v2609_v19, %s2218_s17  ;;  %826 = vrot.lane.b32.xlu1 %v2589_v20, %s2219_s18  ;;  %v739_v14 = vmul.f32 %v2128_v51, %v651_v24  ;;  %v2686_v58 = vpop.permute.xlu1 %1399 }
 0x14b   : > { %3668 = vst [vmem:[#allocation28_spill] sm:$0xff] %v2686_v58  ;;  %v3673_v58 = vlaneseq }
 0x14c   : > { %v2684_v45 = vmul.f32 %v2580_v25, %v739_v14  ;;  %v2700_v25 = vpop.permute.xlu0 %1432 }
 0x14d   : > { %3670 = vst [vmem:[#allocation30_spill] sm:$0xff] %v2700_v25  ;;  %v2755_v43 = vand.u32 127, %v3673_v58 }
 0x14e   : > { %1057 = vrot.lane.b32.xlu0 %v2609_v19, %s2220_s20  ;;  %966 = vrot.lane.b32.xlu1 %v2574_v9, %s2218_s17  ;;  %v2698_v24 = vpop.permute.xlu1 %1437 }
 0x14f   : > { %3669 = vst [vmem:[#allocation29_spill] sm:$0xff] %v2698_v24  ;;  %vm1142_vm1 = vcmp.lt.s32.totalorder %v2755_v43, 108  ;;  %vm834_vm2 = vcmp.lt.s32.totalorder %v2755_v43, 127  ;;  %vm1219_vm3 = vcmp.lt.s32.totalorder %v2755_v43, 92  ;;  %vm988_vm4 = vcmp.lt.s32.totalorder %v2755_v43, 110 }
 0x150   : > { %vm911_vm5 = vcmp.lt.s32.totalorder %v2755_v43, 126  ;;  %vm1065_vm6 = vcmp.lt.s32.totalorder %v2755_v43, 109  ;;  %vm1296_vm7 = vcmp.lt.s32.totalorder %v2755_v43, 91  ;;  %vm1373_vm8 = vcmp.lt.s32.totalorder %v2755_v43, 90 }
 0x152   : > { %1134 = vrot.lane.b32.xlu0 %v2609_v19, %s2222_s22  ;;  %982 = vrot.lane.b32.xlu1 %v2589_v20, %s2218_s17 }
 0x156   : > { %1211 = vrot.lane.b32.xlu0 %v2609_v19, %s2223_s23  ;;  %1043 = vrot.lane.b32.xlu1 %v2574_v9, %s2220_s20 }
 0x15a   : > { %1282 = vrot.lane.b32.xlu0 %v2618_v23, %s2224_s24  ;;  %1059 = vrot.lane.b32.xlu1 %v2589_v20, %s2220_s20 }
 0x15e   : > { %830 = vrot.lane.b32.xlu0 %v2655_v8, %s2219_s18  ;;  %1120 = vrot.lane.b32.xlu1 %v2574_v9, %s2222_s22 }
 0x162   : > { %909 = vrot.lane.b32.xlu0 %v2655_v8, %s2221_s21  ;;  %1136 = vrot.lane.b32.xlu1 %v2589_v20, %s2222_s22 }
 0x166   : > { %986 = vrot.lane.b32.xlu0 %v2655_v8, %s2218_s17  ;;  %1197 = vrot.lane.b32.xlu1 %v2574_v9, %s2223_s23 }
 0x16a   : > { %1063 = vrot.lane.b32.xlu0 %v2655_v8, %s2220_s20  ;;  %1213 = vrot.lane.b32.xlu1 %v2589_v20, %s2223_s23 }
 0x16e   : > { %1199 = vrot.lane.b32.xlu0 %v2508_v3, %s2223_s23  ;;  %818 = vrot.lane.b32.xlu1 %v2618_v23, %s2219_s18 }
 0x172   : > { %828 = vrot.lane.b32.xlu0 %v2684_v45, %s2219_s18  ;;  %903 = vrot.lane.b32.xlu1 %v2609_v19, %s2221_s21 }
 0x176   : > { %899 = vrot.lane.b32.xlu0 %v2511_v5, %s2221_s21  ;;  %974 = vrot.lane.b32.xlu1 %v2618_v23, %s2218_s17 }
 0x17a   : > { %976 = vrot.lane.b32.xlu0 %v2511_v5, %s2218_s17  ;;  %1051 = vrot.lane.b32.xlu1 %v2618_v23, %s2220_s20 }
 0x17c   : > { %v2706_v47 = vpop.permute.xlu0 %964  ;;  %v2708_v48 = vpop.permute.xlu1 %808 }
 0x17e   : > { %1053 = vrot.lane.b32.xlu0 %v2511_v5, %s2220_s20  ;;  %1128 = vrot.lane.b32.xlu1 %v2618_v23, %s2222_s22 }
 0x180   : > { %v2714_v0 = vpop.permute.xlu0 %1041  ;;  %v2716_v55 = vpop.permute.xlu1 %887 }
 0x181   : > { %3671 = vst [vmem:[#allocation31_spill] sm:$0xff] %v2716_v55 }
 0x182   : > { %1130 = vrot.lane.b32.xlu0 %v2511_v5, %s2222_s22  ;;  %1205 = vrot.lane.b32.xlu1 %v2618_v23, %s2223_s23 }
 0x184   : > { %v2722_v59 = vpop.permute.xlu0 %1118  ;;  %v2724_v4 = vpop.permute.xlu1 %814 }
 0x185   : > { %3672 = vst [vmem:[#allocation32_spill] sm:$0xff] %v2724_v4 }
 0x186   : > { %1215 = vrot.lane.b32.xlu0 %v2684_v45, %s2223_s23  ;;  %1288 = vrot.lane.b32.xlu1 %v2609_v19, %s2224_s24 }
 0x188   : > { %v2730_v51 = vpop.permute.xlu0 %1195  ;;  %v2732_v14 = vpop.permute.xlu1 %893 }
 0x18a   : > { %1209 = vrot.lane.b32.xlu0 %v2563_v60, %s2223_s23  ;;  %812 = vrot.lane.b32.xlu1 %v2508_v3, %s2219_s18 }
 0x18c   : > { %v2738_v2 = vpop.permute.xlu0 %816  ;;  %v2740_v62 = vpop.permute.xlu1 %970 }
 0x18d   : > { %v839_v13 = vsel %vm834_vm2, %v2708_v48, %v2738_v2 }
 0x18e   : > { %1276 = vrot.lane.b32.xlu0 %v2508_v3, %s2224_s24  ;;  %891 = vrot.lane.b32.xlu1 %v2508_v3, %s2221_s21  ;;  %v863_v54 = vmul.f32 %v2404_v27, %v839_v13 }
 0x190   : > { %v2746_v52 = vpop.permute.xlu0 %972  ;;  %v2748_v6 = vpop.permute.xlu1 %1047 }
 0x191   : > { %v993_v13 = vsel %vm988_vm4, %v2706_v47, %v2746_v52 }
 0x192   : > { %1292 = vrot.lane.b32.xlu0 %v2684_v45, %s2224_s24  ;;  %968 = vrot.lane.b32.xlu1 %v2508_v3, %s2218_s17  ;;  %v1017_v24 = vmul.f32 %v2556_v50, %v993_v13 }
 0x194   : > { %v2757_v44 = vpop.permute.xlu0 %1049  ;;  %v2759_v25 = vpop.permute.xlu1 %1124 }
 0x195   : > { %3674 = vst [vmem:[#allocation33_spill] sm:$0xff] %v2759_v25  ;;  %v1070_v37 = vsel %vm1065_vm6, %v2714_v0, %v2757_v44 }
 0x196   : > { %1351 = vrot.lane.b32.xlu0 %v2574_v9, %s2225_s27  ;;  %1045 = vrot.lane.b32.xlu1 %v2508_v3, %s2220_s20 }
 0x198   : > { %v2767_v12 = vpop.permute.xlu0 %1126  ;;  %v2769_v10 = vpop.permute.xlu1 %1272 }
 0x199   : > { %3675 = vst [vmem:[#allocation34_spill] sm:$0xff] %v2769_v10  ;;  %v1147_v58 = vsel %vm1142_vm1, %v2722_v59, %v2767_v12 }
 0x19a   : > { %1359 = vrot.lane.b32.xlu0 %v2618_v23, %s2225_s27  ;;  %1122 = vrot.lane.b32.xlu1 %v2508_v3, %s2222_s22 }
 0x19c   : > { %v2784_v39 = vpop.permute.xlu0 %1203  ;;  %v2786_v11 = vpop.permute.xlu1 %1201 }
 0x19d   : > { %3676 = vst [vmem:[#allocation35_spill] sm:$0xff] %v2786_v11  ;;  %v1224_v42 = vsel %vm1219_vm3, %v2730_v51, %v2784_v39  ;;  %v796_v11 = vmul.f32 %v2688_v1, %v2480_v26 }
 0x19e   : > { %1367 = vrot.lane.b32.xlu0 %v2589_v20, %s2225_s27  ;;  %1140 = vrot.lane.b32.xlu1 %v2655_v8, %s2222_s22 }
 0x19f   : > { %v875_v28 = vadd.f32 %v863_v54, %v796_v11  ;;  %v1094_v54 = vmul.f32 %v2591_v18, %v1070_v37  ;;  %v1171_v11 = vmul.f32 %v2611_v57, %v1147_v58 }
 0x1a0   : > { %v2802_v34 = vpop.permute.xlu0 %1132  ;;  %v2804_v17 = vpop.permute.xlu1 %895 }
 0x1a1   : > { %3677 = vst [vmem:[#allocation36_spill] sm:$0xff] %v2802_v34  ;;  %3678 = vst [vmem:[#allocation37_spill] sm:$0xff] %v2804_v17  ;;  %v916_v31 = vsel %vm911_vm5, %v2716_v55, %v2804_v17 }
 0x1a2   : > { %v940_v7 = vmul.f32 %v2531_v16, %v916_v31  ;;  %1278 = vrot.lane.b32.xlu0 %v2500_v49, %s2224_s24  ;;  %820 = vrot.lane.b32.xlu1 %v2511_v5, %s2219_s18 }
 0x1a4   : > { %v952_v25 = vadd.f32 %v940_v7, %v875_v28  ;;  %v890_v34 = vpop.permute.xlu0 %889  ;;  %v2824_v40 = vpop.permute.xlu1 %822  ;;  %v1248_v7 = vmul.f32 %v2632_v63, %v1224_v42 }
 0x1a5   : > { %3679 = vst [vmem:[#allocation38_spill] sm:$0xff] %v2824_v40 }
 0x1a6   : > { %v1029_v31 = vadd.f32 %v1017_v24, %v952_v25  ;;  %1294 = vrot.lane.b32.xlu0 %v2655_v8, %s2224_s24  ;;  %907 = vrot.lane.b32.xlu1 %v2684_v45, %s2221_s21  ;;  %v1429_v24 = vld [vmem:[%s3583_s6 + $0x18] sm:$0xff] }
 0x1a8   : > { %v1106_v56 = vadd.f32 %v1094_v54, %v1029_v31  ;;  %v906_v10 = vpop.permute.xlu0 %905  ;;  %v2832_v16 = vpop.permute.xlu1 %901 }
 0x1a9   : > { %3680 = vst [vmem:[#allocation39_spill] sm:$0xff] %v2832_v16  ;;  %v921_v28 = vsel %vm911_vm5, %v906_v10, %v890_v34 }
 0x1aa   : > { %1361 = vrot.lane.b32.xlu0 %v2511_v5, %s2225_s27  ;;  %984 = vrot.lane.b32.xlu1 %v2684_v45, %s2218_s17  ;;  %v1183_v37 = vadd.f32 %v1171_v11, %v1106_v56  ;;  %v945_v18 = vmul.f32 %v2410_v30, %v921_v28 }
 0x1ac   : > { %v1275_v25 = vpop.permute.xlu0 %1274  ;;  %v2844_v58 = vpop.permute.xlu1 %978  ;;  %v2846_v13 = vadd.f32 %v1248_v7, %v1183_v37 }
 0x1ae   : > { %3681 = vst [vmem:[#allocation40_spill] sm:$0xff] %v2846_v13  ;;  %1447 = vperm.xlu0 %2079, %v1429_v24   ;;  %1061 = vrot.lane.b32.xlu1 %v2684_v45, %s2220_s20 }
 0x1b0   : > { %v1291_v42 = vpop.permute.xlu0 %1290  ;;  %v2851_v54 = vpop.permute.xlu1 %1055 }
 0x1b1   : > { %v2855_v56 = vsel %vm1296_vm7, %v1291_v42, %v1275_v25 }
 0x1b2   : > { %1363 = vrot.lane.b32.xlu0 %v2563_v60, %s2225_s27  ;;  %1138 = vrot.lane.b32.xlu1 %v2684_v45, %s2222_s22 }
 0x1b4   : > { %v2861_v31 = vpop.permute.xlu0 %824  ;;  %v2863_v11 = vpop.permute.xlu1 %1280 }
 0x1b5   : > { %3682 = vst [vmem:[#allocation41_spill] sm:$0xff] %v2863_v11  ;;  %v2869_v7 = vsel %vm834_vm2, %v2738_v2, %v2861_v31 }
 0x1b6   : > { %1207 = vrot.lane.b32.xlu1 %v2511_v5, %s2223_s23 }
 0x1b8   : > { %v898_v37 = vpop.permute.xlu0 %897  ;;  %v2873_v24 = vpop.permute.xlu1 %810 }
 0x1b9   : > { %v2877_v13 = vsel %vm911_vm5, %v898_v37, %v906_v10  ;;  %v2881_v63 = vsel %vm911_vm5, %v890_v34, %v898_v37  ;;  %v801_v34 = vmul.f32 %v2482_v46, %v2589_v20 }
 0x1ba   : > { %1217 = vrot.lane.b32.xlu1 %v2655_v8, %s2223_s23 }
 0x1bc   : > { %v2885_v11 = vpop.permute.xlu0 %980  ;;  %v2887_v2 = vpop.permute.xlu1 %826 }
 0x1bd   : > { %v2893_v57 = vsel %vm988_vm4, %v2746_v52, %v2885_v11  ;;  %v844_v10 = vsel %vm834_vm2, %v2887_v2, %v2873_v24 }
 0x1be   : > { %3683 = vst [vmem:[#allocation42_spill] sm:$0xff] %v2893_v57  ;;  %v868_v37 = vmul.f32 %v2492_v53, %v844_v10  ;;  %1284 = vrot.lane.b32.xlu1 %v2511_v5, %s2224_s24 }
 0x1c0   : > { %v880_v50 = vadd.f32 %v868_v37, %v801_v34  ;;  %v2905_v55 = vpop.permute.xlu0 %1057  ;;  %v2907_v52 = vpop.permute.xlu1 %966 }
 0x1c1   : > { %v2913_v57 = vsel %vm1065_vm6, %v2757_v44, %v2905_v55 }
 0x1c2   : > { %1349 = vrot.lane.b32.xlu1 %v2480_v26, %s2225_s27  ;;  %v957_v20 = vadd.f32 %v945_v18, %v880_v50 }
 0x1c4   : > { %v1135_v10 = vpop.permute.xlu0 %1134  ;;  %v2917_v17 = vpop.permute.xlu1 %982 }
 0x1c5   : > { %v2922_v28 = vsel %vm1142_vm1, %v2767_v12, %v1135_v10  ;;  %v2927_v34 = vsel %vm1142_vm1, %v1135_v10, %v2722_v59  ;;  %v998_v44 = vsel %vm988_vm4, %v2917_v17, %v2907_v52 }
 0x1c6   : > { %v1022_v26 = vmul.f32 %v2408_v29, %v998_v44  ;;  %1357 = vrot.lane.b32.xlu1 %v2529_v15, %s2225_s27 }
 0x1c8   : > { %v1034_v50 = vadd.f32 %v1022_v26, %v957_v20  ;;  %v1212_v18 = vpop.permute.xlu0 %1211  ;;  %v2936_v37 = vpop.permute.xlu1 %1043  ;;  %v1428_v20 = vld [vmem:[%s3583_s6 + $0x10] sm:$0xff] }
 0x1c9   : > { %v2941_v12 = vsel %vm1219_vm3, %v2784_v39, %v1212_v18  ;;  %v2946_v59 = vsel %vm1219_vm3, %v1212_v18, %v2730_v51 }
 0x1ca   : > { %3684 = vst [vmem:[#allocation43_spill] sm:$0xff] %v2941_v12  ;;  %3685 = vst [vmem:[#allocation44_spill] sm:$0xff] %v2946_v59  ;;  %1365 = vrot.lane.b32.xlu1 %v2609_v19, %s2225_s27 }
 0x1cc   : > { %v1283_v10 = vpop.permute.xlu0 %1282  ;;  %v2953_v44 = vpop.permute.xlu1 %1059 }
 0x1cd   : > { %v2957_v26 = vsel %vm1296_vm7, %v1283_v10, %v1291_v42  ;;  %v2961_v39 = vsel %vm1296_vm7, %v1275_v25, %v1283_v10  ;;  %v1075_v51 = vsel %vm1065_vm6, %v2953_v44, %v2936_v37 }
 0x1ce   : > { %3686 = vst [vmem:[#allocation45_spill] sm:$0xff] %v2957_v26  ;;  %3687 = vst [vmem:[#allocation46_spill] sm:$0xff] %v2961_v39  ;;  %v1099_v18 = vmul.f32 %v2416_v33, %v1075_v51  ;;  %1442 = vperm.xlu1 %2080, %v1428_v20   ;;  %v807_v20 = vmul.f32 %v2539_v21, %v2655_v8 }
 0x1d0   : > { %v1111_v5 = vadd.f32 %v1099_v18, %v1034_v50  ;;  %v831_v59 = vpop.permute.xlu0 %830  ;;  %v2968_v12 = vpop.permute.xlu1 %1120  ;;  %v806_v50 = vmul.f32 %v2539_v21, %v2563_v60 }
 0x1d1   : > { %v838_v42 = vsel %vm834_vm2, %v2824_v40, %v831_v59  ;;  %v846_v25 = vsel %vm834_vm2, %v831_v59, %v2724_v4 }
 0x1d2   : > { %v873_v10 = vmul.f32 %v2549_v22, %v838_v42  ;;  %v874_v26 = vmul.f32 %v2549_v22, %v846_v25  ;;  %1286 = vrot.lane.b32.xlu1 %v2563_v60, %s2224_s24 }
 0x1d4   : > { %v910_v51 = vpop.permute.xlu0 %909  ;;  %v2984_v18 = vpop.permute.xlu1 %1136  ;;  %v885_v25 = vadd.f32 %v873_v10, %v806_v50  ;;  %v886_v22 = vadd.f32 %v874_v26, %v807_v20 }
 0x1d5   : > { %v915_v59 = vsel %vm911_vm5, %v2832_v16, %v910_v51  ;;  %v923_v42 = vsel %vm911_vm5, %v910_v51, %v2732_v14  ;;  %v1152_v21 = vsel %vm1142_vm1, %v2984_v18, %v2968_v12 }
 0x1d6   : > { %v950_v4 = vmul.f32 %v2414_v32, %v915_v59  ;;  %v951_v60 = vmul.f32 %v2414_v32, %v923_v42  ;;  %1353 = vrot.lane.b32.xlu1 %v2508_v3, %s2225_s27  ;;  %v1176_v50 = vmul.f32 %v2422_v36, %v1152_v21 }
 0x1d8   : > { %v962_v40 = vadd.f32 %v950_v4, %v885_v25  ;;  %v963_v16 = vadd.f32 %v951_v60, %v886_v22  ;;  %v987_v39 = vpop.permute.xlu0 %986  ;;  %v3000_v33 = vpop.permute.xlu1 %1197  ;;  %v843_v22 = vsel %vm834_vm2, %v2861_v31, %v2708_v48  ;;  %v797_v31 = vmul.f32 %v2688_v1, %v2529_v15 }
 0x1d9   : > { %v992_v26 = vsel %vm988_vm4, %v2844_v58, %v987_v39  ;;  %v1000_v10 = vsel %vm988_vm4, %v987_v39, %v2740_v62  ;;  %v799_v15 = vmul.f32 %v2482_v46, %v2574_v9 }
 0x1da   : > { %v1027_v20 = vmul.f32 %v2601_v61, %v992_v26  ;;  %v1028_v51 = vmul.f32 %v2601_v61, %v1000_v10  ;;  %1369 = vrot.lane.b32.xlu1 %v2684_v45, %s2225_s27  ;;  %v1188_v26 = vadd.f32 %v1176_v50, %v1111_v5  ;;  %v864_v10 = vmul.f32 %v2404_v27, %v2869_v7 }
 0x1db   : > { %v1330_v5 = vmul.f32 %v2432_v41, %v2855_v56  ;;  %v800_v7 = vmul.f32 %v2482_v46, %v2618_v23 }
 0x1dc   : > { %v1039_v4 = vadd.f32 %v1027_v20, %v962_v40  ;;  %v1040_v59 = vadd.f32 %v1028_v51, %v963_v16  ;;  %v1064_v42 = vpop.permute.xlu0 %1063  ;;  %v3017_v25 = vpop.permute.xlu1 %1213  ;;  %v865_v20 = vmul.f32 %v2404_v27, %v843_v22  ;;  %v876_v9 = vadd.f32 %v864_v10, %v797_v31 }
 0x1dd   : > { %v1069_v21 = vsel %vm1065_vm6, %v2851_v54, %v1064_v42  ;;  %v1077_v39 = vsel %vm1065_vm6, %v1064_v42, %v2748_v6  ;;  %v1229_v60 = vsel %vm1219_vm3, %v3017_v25, %v3000_v33 }
 0x1de   : > { %v1104_v40 = vmul.f32 %v2420_v35, %v1069_v21  ;;  %v1105_v16 = vmul.f32 %v2420_v35, %v1077_v39  ;;  %v1253_v48 = vmul.f32 %v2426_v38, %v1229_v60  ;;  %1355 = vrot.lane.b32.xlu1 %v2500_v49, %s2225_s27  ;;  %v798_v60 = vmul.f32 %v2688_v1, %v2609_v19 }
 0x1e0   : > { %v3041_v50 = vadd.f32 %v1104_v40, %v1039_v4  ;;  %v3043_v51 = vadd.f32 %v1105_v16, %v1040_v59  ;;  %v1265_v42 = vadd.f32 %v1253_v48, %v1188_v26  ;;  %v3045_v21 = vpop.permute.xlu0 %1199  ;;  %v819_v39 = vpop.permute.xlu1 %818  ;;  %v877_v1 = vadd.f32 %v865_v20, %v798_v60  ;;  %v3688_v40 = vld [vmem:[#allocation37_spill] sm:$0xff]  ;;  %v3690_v16 = vld [vmem:[#allocation14_spill] sm:$0xff] }
 0x1e1   : > { %v836_v27 = vsel %vm834_vm2, %v819_v39, %v2887_v2  ;;  %v840_v56 = vsel %vm834_vm2, %v2873_v24, %v819_v39  ;;  %v943_v2 = vmul.f32 %v2410_v30, %v2881_v63  ;;  %v944_v24 = vmul.f32 %v2410_v30, %v2877_v13  ;;  %v3689_v30 = vld [vmem:[#allocation31_spill] sm:$0xff] }
 0x1e2   : > { %v866_v22 = vmul.f32 %v2492_v53, %v840_v56  ;;  %v867_v4 = vmul.f32 %v2492_v53, %v836_v27  ;;  %1371 = vrot.lane.b32.xlu1 %v2655_v8, %s2225_s27  ;;  %v3063_v19 = vadd.f32 %v1330_v5, %v1265_v42  ;;  %v997_v53 = vsel %vm988_vm4, %v2885_v11, %v2706_v47  ;;  %v3691_v47 = vld [vmem:[#allocation42_spill] sm:$0xff]  ;;  %v3692_v11 = vld [vmem:[#allocation17_spill] sm:$0xff] }
 0x1e3   : > { %v1074_v8 = vsel %vm1065_vm6, %v2905_v55, %v2714_v0  ;;  %v1018_v5 = vmul.f32 %v3692_v11, %v3691_v47  ;;  %v1019_v42 = vmul.f32 %v3692_v11, %v997_v53 }
 0x1e4   : > { %v878_v59 = vadd.f32 %v866_v22, %v799_v15  ;;  %v879_v26 = vadd.f32 %v867_v4, %v800_v7  ;;  %v3069_v46 = vpop.permute.xlu0 %828  ;;  %v904_v23 = vpop.permute.xlu1 %903  ;;  %v3693_v15 = vld [vmem:[#allocation19_spill] sm:$0xff] }
 0x1e5   : > { %v912_v63 = vsel %vm911_vm5, %v3688_v40, %v904_v23  ;;  %v920_v13 = vsel %vm911_vm5, %v904_v23, %v3689_v30  ;;  %v1095_v27 = vmul.f32 %v3693_v15, %v2913_v57  ;;  %v1096_v56 = vmul.f32 %v3693_v15, %v1074_v8 }
 0x1e6   : > { %v941_v48 = vmul.f32 %v3690_v16, %v912_v63  ;;  %v942_v31 = vmul.f32 %v3690_v16, %v920_v13  ;;  %v955_v10 = vadd.f32 %v943_v2, %v878_v59  ;;  %v956_v20 = vadd.f32 %v944_v24, %v879_v26  ;;  %v3694_v24 = vld [vmem:[#allocation20_spill] sm:$0xff]  ;;  %v3696_v63 = vld [vmem:[#allocation22_spill] sm:$0xff] }
 0x1e7   : > { %v1172_v59 = vmul.f32 %v3694_v24, %v2922_v28  ;;  %v1173_v57 = vmul.f32 %v3694_v24, %v2927_v34  ;;  %v3697_v13 = vld [vmem:[#allocation44_spill] sm:$0xff] }
 0x1e8   : > { %v953_v0 = vadd.f32 %v941_v48, %v876_v9  ;;  %v954_v55 = vadd.f32 %v942_v31, %v877_v1  ;;  %v3090_v39 = vpop.permute.xlu0 %899  ;;  %v975_v60 = vpop.permute.xlu1 %974  ;;  %v1250_v34 = vmul.f32 %v3696_v63, %v3697_v13  ;;  %v3698_v16 = vld [vmem:[#allocation4_spill] sm:$0xff] }
 0x1e9   : > { %v990_v7 = vsel %vm988_vm4, %v975_v60, %v2917_v17  ;;  %v994_v22 = vsel %vm988_vm4, %v2907_v52, %v975_v60  ;;  %v3695_v52 = vld [vmem:[#allocation43_spill] sm:$0xff] }
 0x1ea   : > { %v1030_v4 = vadd.f32 %v1018_v5, %v953_v0  ;;  %v1031_v2 = vadd.f32 %v1019_v42, %v954_v55  ;;  %v1020_v9 = vmul.f32 %v2408_v29, %v994_v22  ;;  %v1021_v1 = vmul.f32 %v2408_v29, %v990_v7 }
 0x1eb   : > { %v1249_v30 = vmul.f32 %v3696_v63, %v3695_v52 }
 0x1ec   : > { %v1107_v26 = vadd.f32 %v1095_v27, %v1030_v4  ;;  %v1108_v23 = vadd.f32 %v1096_v56, %v1031_v2  ;;  %v1032_v53 = vadd.f32 %v1020_v9, %v955_v10  ;;  %v1033_v17 = vadd.f32 %v1021_v1, %v956_v20  ;;  %v3107_v8 = vpop.permute.xlu0 %976  ;;  %v1052_v40 = vpop.permute.xlu1 %1051  ;;  %v3699_v9 = vld [vmem:[#allocation46_spill] sm:$0xff] }
 0x1ed   : > { %v1067_v29 = vsel %vm1065_vm6, %v1052_v40, %v2953_v44  ;;  %v1071_v28 = vsel %vm1065_vm6, %v2936_v37, %v1052_v40 }
 0x1ee   : > { %v1097_v48 = vmul.f32 %v3698_v16, %v1071_v28  ;;  %v1184_v31 = vadd.f32 %v1172_v59, %v1107_v26  ;;  %v1185_v10 = vadd.f32 %v1173_v57, %v1108_v23  ;;  %v1098_v20 = vmul.f32 %v3698_v16, %v1067_v29  ;;  %v3700_v26 = vld [vmem:[#allocation45_spill] sm:$0xff] }
 0x1ef   : > { %v3701_v23 = vld [vmem:[#allocation41_spill] sm:$0xff] }
 0x1f0   : > { %v1109_v47 = vadd.f32 %v1097_v48, %v1032_v53  ;;  %v3121_v11 = vpop.permute.xlu0 %1053  ;;  %v1129_v5 = vpop.permute.xlu1 %1128  ;;  %v1261_v42 = vadd.f32 %v1249_v30, %v1184_v31  ;;  %v1262_v0 = vadd.f32 %v1250_v34, %v1185_v10  ;;  %v1110_v15 = vadd.f32 %v1098_v20, %v1033_v17  ;;  %v3702_v53 = vld [vmem:[#allocation34_spill] sm:$0xff] }
 0x1f1   : > { %v1144_v44 = vsel %vm1142_vm1, %v1129_v5, %v2984_v18  ;;  %v1148_v37 = vsel %vm1142_vm1, %v2968_v12, %v1129_v5 }
 0x1f2   : > { %v1174_v55 = vmul.f32 %v2422_v36, %v1148_v37  ;;  %v1175_v60 = vmul.f32 %v2422_v36, %v1144_v44  ;;  %v1328_v36 = vmul.f32 %v2432_v41, %v3699_v9  ;;  %v3705_v9 = vld [vmem:[#allocation36_spill] sm:$0xff] }
 0x1f4   : > { %v3131_v27 = vpop.permute.xlu0 %1130  ;;  %v1206_v56 = vpop.permute.xlu1 %1205  ;;  %v1186_v22 = vadd.f32 %v1174_v55, %v1109_v47  ;;  %v1187_v4 = vadd.f32 %v1175_v60, %v1110_v15 }
 0x1f5   : > { %v1221_v7 = vsel %vm1219_vm3, %v1206_v56, %v3017_v25  ;;  %v1225_v18 = vsel %vm1219_vm3, %v3000_v33, %v1206_v56  ;;  %v1329_v25 = vmul.f32 %v2432_v41, %v3700_v26  ;;  %v3704_v56 = vld [vmem:[#allocation8_spill] sm:$0xff] }
 0x1f6   : > { %v1251_v12 = vmul.f32 %v2426_v38, %v1225_v18  ;;  %v1252_v2 = vmul.f32 %v2426_v38, %v1221_v7  ;;  %v3703_v38 = vld [vmem:[#allocation24_spill] sm:$0xff] }
 0x1f8   : > { %v1263_v1 = vadd.f32 %v1251_v12, %v1186_v22  ;;  %v1264_v24 = vadd.f32 %v1252_v2, %v1187_v4  ;;  %v3143_v59 = vpop.permute.xlu0 %1215  ;;  %v1289_v57 = vpop.permute.xlu1 %1288 }
 0x1f9   : > { %v1297_v33 = vsel %vm1296_vm7, %v3701_v23, %v1289_v57  ;;  %v1305_v17 = vsel %vm1296_vm7, %v1289_v57, %v3702_v53  ;;  %v3707_v57 = vld [vmem:[#allocation29_spill] sm:$0xff] }
 0x1fa   : > { %v1326_v40 = vmul.f32 %v3703_v38, %v1297_v33  ;;  %v1327_v52 = vmul.f32 %v3703_v38, %v1305_v17  ;;  %v1340_v63 = vadd.f32 %v1328_v36, %v1263_v1  ;;  %v1341_v30 = vadd.f32 %v1329_v25, %v1264_v24  ;;  %v3706_v1 = vld [vmem:[#allocation33_spill] sm:$0xff]  ;;  %v3708_v17 = vld [vmem:[#allocation6_spill] sm:$0xff] }
 0x1fc   : > { %v3155_v29 = vadd.f32 %v1326_v40, %v1261_v42  ;;  %v3157_v28 = vadd.f32 %v1327_v52, %v1262_v0  ;;  %v3159_v13 = vpop.permute.xlu0 %1209  ;;  %v813_v41 = vpop.permute.xlu1 %812 }
 0x1fd   : > { %v845_v34 = vsel %vm834_vm2, %v3069_v46, %v813_v41 }
 0x200   : > { %v3164_v16 = vpop.permute.xlu0 %1276  ;;  %v892_v48 = vpop.permute.xlu1 %891 }
 0x201   : > { %v918_v31 = vsel %vm911_vm5, %v892_v48, %v3090_v39 }
 0x204   : > { %v3169_v10 = vpop.permute.xlu0 %1292  ;;  %v3171_v20 = vpop.permute.xlu1 %968 }
 0x205   : > { %v3177_v47 = vsel %vm1296_vm7, %v3169_v10, %v3164_v16  ;;  %v995_v5 = vsel %vm988_vm4, %v3171_v20, %v3107_v8 }
 0x208   : > { %v1352_v42 = vpop.permute.xlu0 %1351  ;;  %v3183_v0 = vpop.permute.xlu1 %1045 }
 0x209   : > { %v1072_v44 = vsel %vm1065_vm6, %v3183_v0, %v3121_v11 }
 0x20c   : > { %v1360_v37 = vpop.permute.xlu0 %1359  ;;  %v3190_v55 = vpop.permute.xlu1 %1122 }
 0x20d   : > { %v1379_v60 = vsel %vm1373_vm8, %v1352_v42, %v1360_v37  ;;  %v1149_v15 = vsel %vm1142_vm1, %v3190_v55, %v3131_v27 }
 0x20e   : > { %v1405_v7 = vmul.f32 %v3704_v56, %v1379_v60 }
 0x210   : > { %v1417_v18 = vadd.f32 %v1405_v7, %v1340_v63  ;;  %v1368_v22 = vpop.permute.xlu0 %1367  ;;  %v1141_v4 = vpop.permute.xlu1 %1140 }
 0x211   : > { %v1375_v12 = vsel %vm1373_vm8, %v1360_v37, %v1368_v22  ;;  %v1383_v2 = vsel %vm1373_vm8, %v1368_v22, %v1352_v42  ;;  %v1146_v36 = vsel %vm1142_vm1, %v3705_v9, %v1141_v4  ;;  %v1154_v24 = vsel %vm1142_vm1, %v1141_v4, %v3706_v1 }
 0x212   : > { %v3210_v26 = vadd.f32 %v3707_v57, %v1417_v18  ;;  %v1406_v25 = vmul.f32 %v3704_v56, %v1375_v12  ;;  %v1407_v33 = vmul.f32 %v3704_v56, %v1383_v2  ;;  %v1181_v40 = vmul.f32 %v3708_v17, %v1146_v36  ;;  %v3709_v18 = vld [vmem:[#allocation13_spill] sm:$0xff] }
 0x213   : > { %v1182_v52 = vmul.f32 %v3708_v17, %v1154_v24  ;;  %v802_v22 = vmul.f32 %v3709_v18, %v2508_v3  ;;  %v3711_v3 = vld [vmem:[#allocation12_spill] sm:$0xff] }
 0x214   : > { %v1966_v63 = vmul.f32 -1.442695, %v3210_v26  ;;  %v1418_v42 = vadd.f32 %v1406_v25, %v1341_v30  ;;  %v1419_v37 = vadd.f32 %v1407_v33, %v3063_v19  ;;  %v3219_v60 = vadd.f32 %v1181_v40, %v3041_v50  ;;  %v821_v7 = vpop.permute.xlu1 %820  ;;  %v3710_v30 = vld [vmem:[#allocation2_spill] sm:$0xff] }
 0x215   : > { %v3224_v4 = vadd.f32 %v1182_v52, %v3043_v51  ;;  %v837_v56 = vsel %vm834_vm2, %v821_v7, %v3069_v46  ;;  %v841_v12 = vsel %vm834_vm2, %v813_v41, %v821_v7  ;;  %v803_v51 = vmul.f32 %v3709_v18, %v3711_v3  ;;  %v3712_v46 = vld [vmem:[#allocation3_spill] sm:$0xff] }
 0x216   : > { %2129 = vpow2.f32 %v1966_v63  ;;  %v3232_v19 = vadd.f32 %v3707_v57, %v1418_v42  ;;  %v3235_v50 = vadd.f32 %v3707_v57, %v1419_v37  ;;  %v869_v2 = vmul.f32 %v3710_v30, %v841_v12  ;;  %v3713_v63 = vld [vmem:[#allocation18_spill] sm:$0xff] }
 0x217   : > { %v871_v36 = vmul.f32 %v3710_v30, %v845_v34  ;;  %v870_v24 = vmul.f32 %v3710_v30, %v837_v56  ;;  %v946_v25 = vmul.f32 %v3712_v46, %v918_v31  ;;  %v804_v57 = vmul.f32 %v3709_v18, %v2684_v45  ;;  %v3714_v30 = vld [vmem:[#allocation5_spill] sm:$0xff] }
 0x218   : > { %v1967_v41 = vmul.f32 -1.442695, %v3232_v19  ;;  %v1968_v33 = vmul.f32 -1.442695, %v3235_v50  ;;  %v881_v40 = vadd.f32 %v869_v2, %v802_v22  ;;  %v908_v52 = vpop.permute.xlu1 %907  ;;  %v1023_v42 = vmul.f32 %v3713_v63, %v995_v5 }
 0x219   : > { %v914_v37 = vsel %vm911_vm5, %v3090_v39, %v908_v52  ;;  %v922_v34 = vsel %vm911_vm5, %v908_v52, %v892_v48  ;;  %v882_v31 = vadd.f32 %v870_v24, %v803_v51  ;;  %v883_v12 = vadd.f32 %v871_v36, %v804_v57  ;;  %v3715_v51 = vld [vmem:[#allocation21_spill] sm:$0xff] }
 0x21a   : > { %2131 = vpow2.f32 %v1967_v41  ;;  %v958_v7 = vadd.f32 %v946_v25, %v881_v40  ;;  %v947_v56 = vmul.f32 %v3712_v46, %v914_v37  ;;  %v948_v22 = vmul.f32 %v3712_v46, %v922_v34 }
 0x21b   : > { %2133 = vpow2.f32 %v1968_v33  ;;  %v1100_v45 = vmul.f32 %v3714_v30, %v1072_v44  ;;  %v1177_v24 = vmul.f32 %v3715_v51, %v1149_v15 }
 0x21c   : > { %v1035_v18 = vadd.f32 %v1023_v42, %v958_v7  ;;  %v959_v5 = vadd.f32 %v947_v56, %v882_v31  ;;  %v985_v2 = vpop.permute.xlu1 %984  ;;  %v960_v3 = vadd.f32 %v948_v22, %v883_v12  ;;  %v1230_v56 = vsel %vm1219_vm3, %v3143_v59, %v3045_v21 }
 0x21d   : > { %v991_v39 = vsel %vm988_vm4, %v3107_v8, %v985_v2  ;;  %v999_v48 = vsel %vm988_vm4, %v985_v2, %v3171_v20 }
 0x21e   : > { %v1024_v36 = vmul.f32 %v3713_v63, %v991_v39  ;;  %v1025_v46 = vmul.f32 %v3713_v63, %v999_v48  ;;  %v1112_v25 = vadd.f32 %v1100_v45, %v1035_v18  ;;  %v3716_v18 = vld [vmem:[#allocation23_spill] sm:$0xff]  ;;  %v3717_v48 = vld [vmem:[#allocation25_spill] sm:$0xff] }
 0x220   : > { %v2130_v44 = vpop.eup %2129  ;;  %v1036_v41 = vadd.f32 %v1024_v36, %v959_v5  ;;  %v1037_v33 = vadd.f32 %v1025_v46, %v960_v3  ;;  %v1062_v40 = vpop.permute.xlu1 %1061  ;;  %v1189_v52 = vadd.f32 %v1177_v24, %v1112_v25  ;;  %v1256_v5 = vmul.f32 %v3716_v18, %v1230_v56 }
 0x221   : > { %v1501_v57 = vadd.f32 1.0, %v2130_v44  ;;  %v1068_v8 = vsel %vm1065_vm6, %v3121_v11, %v1062_v40  ;;  %v1076_v20 = vsel %vm1065_vm6, %v1062_v40, %v3183_v0  ;;  %v1333_v24 = vmul.f32 %v3717_v48, %v3177_v47  ;;  %v1546_v47 = vld [vmem:[%s3579_s2] sm:$0x7]  ;;  %v3718_v40 = vld [vmem:[#allocation7_spill] sm:$0xff] }
 0x222   : > { %v1101_v15 = vmul.f32 %v3714_v30, %v1068_v8  ;;  %v1102_v42 = vmul.f32 %v3714_v30, %v1076_v20 }
 0x223   : > { %2135 = vrcp.f32 %v1501_v57 }
 0x224   : > { %v2132_v63 = vpop.eup %2131  ;;  %v1113_v37 = vadd.f32 %v1101_v15, %v1036_v41  ;;  %v1114_v34 = vadd.f32 %v1102_v42, %v1037_v33  ;;  %v1139_v31 = vpop.permute.xlu1 %1138  ;;  %v3719_v15 = vld [vmem:[#allocation11_spill] sm:$0xff] }
 0x225   : > { %v2134_v7 = vpop.eup %2133  ;;  %v1502_v11 = vadd.f32 1.0, %v2132_v63  ;;  %v1145_v0 = vsel %vm1142_vm1, %v3131_v27, %v1139_v31  ;;  %v1153_v12 = vsel %vm1142_vm1, %v1139_v31, %v3190_v55  ;;  %v3315_v42 = vrot.slane %v1546_v47, %v3719_v15  ;;  %v3720_v63 = vld [vmem:[#allocation10_spill] sm:$0xff] }
 0x226   : > { %v1503_v22 = vadd.f32 1.0, %v2134_v7  ;;  %v1178_v30 = vmul.f32 %v3715_v51, %v1145_v0  ;;  %v1179_v45 = vmul.f32 %v3715_v51, %v1153_v12 }
 0x227   : > { %2137 = vrcp.f32 %v1502_v11 }
 0x228   : > { %2139 = vrcp.f32 %v1503_v22  ;;  %v1190_v2 = vadd.f32 %v1178_v30, %v1113_v37  ;;  %v1191_v3 = vadd.f32 %v1179_v45, %v1114_v34  ;;  %v1208_v39 = vpop.permute.xlu1 %1207  ;;  %v3721_v37 = vsub.s32 1, %v3720_v63 }
 0x229   : > { %v1222_v27 = vsel %vm1219_vm3, %v1208_v39, %v3143_v59  ;;  %v1226_v51 = vsel %vm1219_vm3, %v3045_v21, %v1208_v39 }
 0x22a   : > { %v1268_v55 = vadd.f32 %v1256_v5, %v1191_v3  ;;  %v1255_v36 = vmul.f32 %v3716_v18, %v1222_v27  ;;  %v1254_v33 = vmul.f32 %v3716_v18, %v1226_v51  ;;  %v3319_v34 = vrot.slane %v1546_v47, %v3721_v37  ;;  %v3723_v27 = vld [vmem:[#allocation40_spill] sm:$0xff] }
 0x22c   : > { %v1267_v46 = vadd.f32 %v1255_v36, %v1190_v2  ;;  %v3295_v25 = vpop.permute.xlu1 %1217  ;;  %v3297_v44 = vadd.f32 %v1333_v24, %v1268_v55  ;;  %v1266_v12 = vadd.f32 %v1254_v33, %v1189_v52  ;;  %v3724_v24 = vld [vmem:[#allocation26_spill] sm:$0xff] }
 0x22d   : > { %v2136_v41 = vpop.eup %2135  ;;  %v1223_v59 = vsel %vm1219_vm3, %v3159_v13, %v3295_v25 }
 0x22e   : > { %v1258_v57 = vmul.f32 %v3718_v40, %v1223_v59  ;;  %v3309_v21 = vmul.f32 %v2136_v41, %v3210_v26  ;;  %v3725_v41 = vld [vmem:[#allocation30_spill] sm:$0xff] }
 0x230   : > { %v3312_v8 = vadd.f32 %v1258_v57, %v3219_v60  ;;  %v1285_v20 = vpop.permute.xlu1 %1284  ;;  %v3722_v60 = vsub.s32 2, %v3720_v63 }
 0x231   : > { %v2138_v31 = vpop.eup %2137  ;;  %v1299_v7 = vsel %vm1296_vm7, %v1285_v20, %v3169_v10  ;;  %v1303_v26 = vsel %vm1296_vm7, %v3164_v16, %v1285_v20  ;;  %v1301_v10 = vsel %vm1296_vm7, %v3702_v53, %v3701_v23 }
 0x232   : > { %v3329_v56 = vrot.slane %v1546_v47, %v3722_v60  ;;  %v2140_v11 = vpop.eup %2139  ;;  %v3332_v0 = vmul.f32 %v2138_v31, %v3232_v19  ;;  %v1331_v22 = vmul.f32 %v3717_v48, %v1303_v26  ;;  %v1332_v30 = vmul.f32 %v3717_v48, %v1299_v7  ;;  %v1279_v60 = vpop.permute.xlu0 %1278 }
 0x233   : > { %v3341_v16 = vmul.f32 %v2140_v11, %v3235_v50  ;;  %v1566_v19 = vmul.f32 %v3315_v42, %v3309_v21  ;;  %v1325_v2 = vmul.f32 %v3703_v38, %v1301_v10  ;;  %v3726_v11 = vld [vmem:[#allocation38_spill] sm:$0xff] }
 0x234   : > { %v3343_v45 = vadd.f32 %v1331_v22, %v1266_v12  ;;  %v3345_v18 = vadd.f32 %v1332_v30, %v1267_v46  ;;  %v1350_v5 = vpop.permute.xlu1 %1349  ;;  %v1567_v52 = vmul.f32 %v3319_v34, %v3332_v0  ;;  %v3727_v12 = vld [vmem:[#allocation32_spill] sm:$0xff] }
 0x235   : > { %v1568_v3 = vmul.f32 %v3329_v56, %v3341_v16  ;;  %v1337_v48 = vadd.f32 %v1325_v2, %v3723_v27  ;;  %v3729_v30 = vld [vmem:[#allocation16_spill] sm:$0xff] }
 0x236   : > { %v1579_v23 = vadd.f32 %v1567_v52, %v1566_v19  ;;  %v996_v19 = vsel %vm988_vm4, %v2740_v62, %v2844_v58  ;;  %v3730_v52 = vld [vmem:[#allocation15_spill] sm:$0xff] }
 0x237   : > { %v805_v2 = vmul.f32 %v3730_v52, %v2500_v49  ;;  %v1026_v27 = vmul.f32 %v2601_v61, %v996_v19  ;;  %v3731_v61 = vld [vmem:[#allocation35_spill] sm:$0xff] }
 0x238   : > { %v1358_v53 = vpop.permute.xlu1 %1357  ;;  %v1580_v50 = vadd.f32 %v1579_v23, %v1568_v3  ;;  %v1295_v23 = vpop.permute.xlu0 %1294 }
 0x239   : > { %v1378_v39 = vsel %vm1373_vm8, %v1350_v5, %v1358_v53 }
 0x23a   : > { %v1402_v55 = vmul.f32 %v3724_v24, %v1378_v39  ;;  %1581 = vadd.xlane.f32.xlu1 %v1580_v50 }
 0x23c   : > { %v1414_v36 = vadd.f32 %v1402_v55, %v1337_v48  ;;  %v1366_v51 = vpop.permute.xlu1 %1365 }
 0x23d   : > { %v1374_v46 = vsel %vm1373_vm8, %v1358_v53, %v1366_v51  ;;  %v1382_v38 = vsel %vm1373_vm8, %v1366_v51, %v1350_v5  ;;  %v1362_v51 = vpop.permute.xlu0 %1361 }
 0x23e   : > { %v3363_v59 = vadd.f32 %v3725_v41, %v1414_v36  ;;  %v1403_v47 = vmul.f32 %v3724_v24, %v1374_v46  ;;  %v1404_v33 = vmul.f32 %v3724_v24, %v1382_v38  ;;  %v1227_v46 = vsel %vm1219_vm3, %v3731_v61, %v3159_v13 }
 0x240   : > { %v1963_v57 = vmul.f32 -1.442695, %v3363_v59  ;;  %v1415_v20 = vadd.f32 %v1403_v47, %v3155_v29  ;;  %v1416_v63 = vadd.f32 %v1404_v33, %v3157_v28  ;;  %v842_v29 = vsel %vm834_vm2, %v3727_v12, %v3726_v11  ;;  %v3728_v28 = vld [vmem:[#allocation39_spill] sm:$0xff]  ;;  %v3733_v12 = vld [vmem:[#allocation9_spill] sm:$0xff] }
 0x241   : > { %v919_v22 = vsel %vm911_vm5, %v2732_v14, %v3728_v28  ;;  %v872_v10 = vmul.f32 %v3729_v30, %v842_v29  ;;  %v1073_v14 = vsel %vm1065_vm6, %v2748_v6, %v2851_v54  ;;  %v1150_v6 = vsel %vm1142_vm1, %v3706_v1, %v3705_v9  ;;  %v1448_v33 = vpop.permute.xlu0 %1447  ;;  %v3732_v1 = vld [vmem:[#allocation27_spill] sm:$0xff] }
 0x242   : > { %2141 = vpow2.f32 %v1963_v57  ;;  %v3371_v37 = vadd.f32 %v3725_v41, %v1415_v20  ;;  %v3374_v31 = vadd.f32 %v3725_v41, %v1416_v63  ;;  %v949_v3 = vmul.f32 %v2414_v32, %v919_v22 }
 0x243   : > { %v884_v39 = vadd.f32 %v872_v10, %v805_v2  ;;  %v1103_v58 = vmul.f32 %v2420_v35, %v1073_v14  ;;  %v1231_v35 = vsel %vm1219_vm3, %v3295_v25, %v3731_v61  ;;  %v1180_v47 = vmul.f32 %v3708_v17, %v1150_v6 }
 0x244   : > { %v1964_v7 = vmul.f32 -1.442695, %v3371_v37  ;;  %v1965_v26 = vmul.f32 -1.442695, %v3374_v31  ;;  %v1257_v20 = vmul.f32 %v3718_v40, %v1227_v46  ;;  %v1259_v13 = vmul.f32 %v3718_v40, %v1231_v35 }
 0x245   : > { %v961_v62 = vadd.f32 %v949_v3, %v884_v39  ;;  %v1308_v22 = vsel %vm1296_vm7, %v1295_v23, %v1279_v60  ;;  %v1364_v2 = vpop.permute.xlu0 %1363 }
 0x246   : > { %2143 = vpow2.f32 %v1964_v7 }
 0x247   : > { %2145 = vpow2.f32 %v1965_v26  ;;  %v1038_v36 = vadd.f32 %v1026_v27, %v961_v62  ;;  %v1336_v27 = vmul.f32 %v3733_v12, %v1308_v22 }
 0x249   : > { %v1115_v54 = vadd.f32 %v1103_v58, %v1038_v36  ;;  %v3734_v58 = vld [vmem:[#allocation28_spill] sm:$0xff] }
 0x24b   : > { %v1192_v7 = vadd.f32 %v1180_v47, %v1115_v54 }
 0x24c   : > { %v2142_v5 = vpop.eup %2141 }
 0x24d   : > { %v1498_v53 = vadd.f32 1.0, %v2142_v5  ;;  %v1443_v50 = vpop.permute.xlu1 %1442  ;;  %v1269_v10 = vadd.f32 %v1257_v20, %v1192_v7  ;;  %v1271_v5 = vadd.f32 %v1259_v13, %v3224_v4 }
 0x24f   : > { %2147 = vrcp.f32 %v1498_v53 }
 0x250   : > { %v2144_v48 = vpop.eup %2143 }
 0x251   : > { %v2146_v24 = vpop.eup %2145  ;;  %v1499_v49 = vadd.f32 1.0, %v2144_v48  ;;  %v1287_v55 = vpop.permute.xlu1 %1286 }
 0x252   : > { %v1500_v32 = vadd.f32 1.0, %v2146_v24  ;;  %v1304_v9 = vsel %vm1296_vm7, %v1279_v60, %v1287_v55  ;;  %v1300_v11 = vsel %vm1296_vm7, %v1287_v55, %v1295_v23  ;;  %v1348_v55 = vadd.f32 %v1336_v27, %v1271_v5 }
 0x253   : > { %2149 = vrcp.f32 %v1499_v49  ;;  %v1334_v17 = vmul.f32 %v3733_v12, %v1304_v9  ;;  %v1335_v3 = vmul.f32 %v3733_v12, %v1300_v11 }
 0x254   : > { %2151 = vrcp.f32 %v1500_v32 }
 0x255   : > { %v1354_v38 = vpop.permute.xlu1 %1353  ;;  %v1346_v4 = vadd.f32 %v1334_v17, %v1269_v10  ;;  %v1347_v32 = vadd.f32 %v1335_v3, %v3312_v8 }
 0x256   : > { %v1380_v41 = vsel %vm1373_vm8, %v1354_v38, %v1362_v51 }
 0x257   : > { %v1408_v57 = vmul.f32 %v3732_v1, %v1380_v41 }
 0x259   : > { %v2148_v63 = vpop.eup %2147  ;;  %v1420_v25 = vadd.f32 %v1408_v57, %v3343_v45  ;;  %v1370_v26 = vpop.permute.xlu1 %1369 }
 0x25a   : > { %v1376_v29 = vsel %vm1373_vm8, %v1362_v51, %v1370_v26  ;;  %v1384_v28 = vsel %vm1373_vm8, %v1370_v26, %v1354_v38  ;;  %v3436_v19 = vmul.f32 %v2148_v63, %v3363_v59 }
 0x25b   : > { %v3430_v40 = vadd.f32 %v1443_v50, %v1420_v25  ;;  %v1409_v30 = vmul.f32 %v3732_v1, %v1376_v29  ;;  %v1410_v45 = vmul.f32 %v3732_v1, %v1384_v28 }
 0x25d   : > { %v2150_v52 = vpop.eup %2149  ;;  %v1969_v53 = vmul.f32 -1.442695, %v3430_v40  ;;  %v1421_v60 = vadd.f32 %v1409_v30, %v3345_v18  ;;  %v1422_v23 = vadd.f32 %v1410_v45, %v3297_v44  ;;  %v1356_v14 = vpop.permute.xlu1 %1355  ;;  %v1563_v44 = vmul.f32 %v3315_v42, %v3436_v19 }
 0x25e   : > { %v2152_v39 = vpop.eup %2151  ;;  %v3444_v48 = vmul.f32 %v2150_v52, %v3371_v37  ;;  %v1381_v59 = vsel %vm1373_vm8, %v1356_v14, %v1364_v2 }
 0x25f   : > { %2153 = vpow2.f32 %v1969_v53  ;;  %v1457_v24 = vadd.f32 %v1443_v50, %v1421_v60  ;;  %v1458_v62 = vadd.f32 %v1443_v50, %v1422_v23  ;;  %v1411_v49 = vmul.f32 %v3734_v58, %v1381_v59 }
 0x260   : > { %v3450_v18 = vmul.f32 %v2152_v39, %v3374_v31  ;;  %v1564_v37 = vmul.f32 %v3319_v34, %v3444_v48 }
 0x261   : > { %v1970_v36 = vmul.f32 -1.442695, %v1457_v24  ;;  %v1971_v51 = vmul.f32 -1.442695, %v1458_v62  ;;  %v1423_v6 = vadd.f32 %v1411_v49, %v1346_v4  ;;  %v1372_v54 = vpop.permute.xlu1 %1371 }
 0x262   : > { %v1377_v50 = vsel %vm1373_vm8, %v1364_v2, %v1372_v54  ;;  %v1385_v61 = vsel %vm1373_vm8, %v1372_v54, %v1356_v14  ;;  %v1565_v31 = vmul.f32 %v3329_v56, %v3450_v18  ;;  %v1575_v46 = vadd.f32 %v1564_v37, %v1563_v44  ;;  %v1595_v54 = vld [vmem:[%s3584_s7] sm:$0xff] }
 0x263   : > { %2155 = vpow2.f32 %v1970_v36  ;;  %v1459_v35 = vadd.f32 %v1448_v33, %v1423_v6  ;;  %v1412_v38 = vmul.f32 %v3734_v58, %v1377_v50  ;;  %v1413_v8 = vmul.f32 %v3734_v58, %v1385_v61 }
 0x264   : > { %2157 = vpow2.f32 %v1971_v51  ;;  %v1576_v41 = vadd.f32 %v1575_v46, %v1565_v31 }
 0x265   : > { %v1972_v47 = vmul.f32 -1.442695, %v1459_v35  ;;  %v1424_v9 = vadd.f32 %v1412_v38, %v1347_v32  ;;  %v1425_v1 = vadd.f32 %v1413_v8, %v1348_v55  ;;  %v1598_v8 = vld [vmem:[%s3584_s7 + $0x18] sm:$0xff] }
 0x266   : > { %1577 = vadd.xlane.f32.xlu0 %v1576_v41 }
 0x267   : > { %2159 = vpow2.f32 %v1972_v47  ;;  %v1460_v57 = vadd.f32 %v1448_v33, %v1424_v9  ;;  %v1461_v20 = vadd.f32 %v1448_v33, %v1425_v1 }
 0x269   : > { %v2154_v13 = vpop.eup %2153  ;;  %v1973_v63 = vmul.f32 -1.442695, %v1460_v57  ;;  %v1974_v7 = vmul.f32 -1.442695, %v1461_v20 }
 0x26a   : > { %v1504_v25 = vadd.f32 1.0, %v2154_v13 }
 0x26b   : > { %2161 = vpow2.f32 %v1973_v63 }
 0x26c   : > { %2163 = vrcp.f32 %v1504_v25 }
 0x26d   : > { %v2156_v26 = vpop.eup %2155  ;;  %2165 = vpow2.f32 %v1974_v7 }
 0x26e   : > { %v2158_v11 = vpop.eup %2157  ;;  %v1505_v12 = vadd.f32 1.0, %v2156_v26 }
 0x26f   : > { %v1506_v17 = vadd.f32 1.0, %v2158_v11 }
 0x270   : > { %2167 = vrcp.f32 %v1505_v12 }
 0x271   : > { %v2160_v29 = vpop.eup %2159  ;;  %2169 = vrcp.f32 %v1506_v17 }
 0x272   : > { %v1507_v28 = vadd.f32 1.0, %v2160_v29  ;;  %v1617_v29 = vld [vmem:[%s3585_s8] sm:$0x1] }
 0x274   : > { %2171 = vrcp.f32 %v1507_v28 }
 0x275   : > { %v2162_v22 = vpop.eup %2161 }
 0x276   : > { %v2164_v30 = vpop.eup %2163  ;;  %v1508_v45 = vadd.f32 1.0, %v2162_v22 }
 0x277   : > { %v2166_v33 = vpop.eup %2165  ;;  %v3466_v5 = vmul.f32 %v2164_v30, %v3430_v40 }
 0x278   : > { %v1509_v10 = vadd.f32 1.0, %v2166_v33  ;;  %2173 = vrcp.f32 %v1508_v45 }
 0x279   : > { %v1569_v60 = vmul.f32 %v3315_v42, %v3466_v5 }
 0x27a   : > { %v2168_v52 = vpop.eup %2167  ;;  %2175 = vrcp.f32 %v1509_v10 }
 0x27b   : > { %v2170_v2 = vpop.eup %2169  ;;  %v3468_v3 = vmul.f32 %v2168_v52, %v1457_v24 }
 0x27c   : > { %v3470_v53 = vmul.f32 %v2170_v2, %v1458_v62  ;;  %v1627_v2 = vld [vmem:[%s3586_s9 + $0x8] sm:$0xff] }
 0x27d   : > { %v1570_v23 = vmul.f32 %v3319_v34, %v3468_v3 }
 0x27e   : > { %v2172_v14 = vpop.eup %2171  ;;  %v1571_v39 = vmul.f32 %v3329_v56, %v3470_v53 }
 0x27f   : > { %v1583_v27 = vadd.f32 %v1570_v23, %v1569_v60  ;;  %v3478_v40 = vmul.f32 %v2172_v14, %v1459_v35  ;;  %v1626_v60 = vld [vmem:[%s3586_s9] sm:$0xff]  ;;  %v1629_v14 = vld [vmem:[%s3586_s9 + $0x18] sm:$0xff] }
 0x281   : > { %v1584_v4 = vadd.f32 %v1583_v27, %v1571_v39  ;;  %v1572_v49 = vmul.f32 %v3315_v42, %v3478_v40  ;;  %v1596_v42 = vld [vmem:[%s3584_s7 + $0x8] sm:$0xff]  ;;  %v1628_v39 = vld [vmem:[%s3586_s9 + $0x10] sm:$0xff] }
 0x282   : > { %v2174_v59 = vpop.eup %2173 }
 0x283   : > { %v3480_v58 = vmul.f32 %v2174_v59, %v1460_v57  ;;  %1585 = vadd.xlane.f32.xlu0 %v1584_v4 }
 0x284   : > { %v2176_v24 = vpop.eup %2175 }
 0x285   : > { %v3482_v62 = vmul.f32 %v2176_v24, %v1461_v20  ;;  %v1573_v55 = vmul.f32 %v3319_v34, %v3480_v58  ;;  %v1597_v34 = vld [vmem:[%s3584_s7 + $0x10] sm:$0xff] }
 0x287   : > { %v1574_v44 = vmul.f32 %v3329_v56, %v3482_v62  ;;  %v1587_v37 = vadd.f32 %v1573_v55, %v1572_v49 }
 0x289   : > { %v1588_v32 = vadd.f32 %v1587_v37, %v1574_v44  ;;  %v1651_v37 = vld [vmem:[%s3587_s10 + $0x8] sm:$0xff] }
 0x28b   : > { %1589 = vadd.xlane.f32.xlu0 %v1588_v32  ;;  %v1650_v32 = vld [vmem:[%s3587_s10] sm:$0xff] }
 0x2c7   : > { %v1582_v51 = vpop.xlane.xlu1 %1581 }
 0x2c8   : > { %v1592_v61 = vmul.f32 0.00390625, %v1582_v51 }
 0x2ca   : > { %v1600_v46 = vmul.f32 %v1596_v42, %v1592_v61  ;;  %v1652_v61 = vld [vmem:[%s3587_s10 + $0x10] sm:$0xff] }
 0x2cc   : > { %v1605_v47 = vsel %vm1603_vm9, %v1600_v46, 0.0 }
 0x2f3   : > { %v1578_v36 = vpop.xlane.xlu0 %1577 }
 0x2f4   : > { %v1591_v6 = vmul.f32 0.00390625, %v1578_v36 }
 0x2f6   : > { %v1599_v56 = vmul.f32 %v1595_v54, %v1591_v6 }
 0x2f8   : > { %v1604_v38 = vsel %vm1603_vm9, %v1599_v56, 0.0 }
 0x2f9   : > { %v1606_v57 = vadd.f32 %v1605_v47, %v1604_v38 }
 0x310   : > { %v1586_v50 = vpop.xlane.xlu0 %1585 }
 0x311   : > { %v1593_v31 = vmul.f32 0.00390625, %v1586_v50  ;;  %v1653_v50 = vld [vmem:[%s3587_s10 + $0x18] sm:$0xff] }
 0x313   : > { %v1601_v35 = vmul.f32 %v1597_v34, %v1593_v31 }
 0x315   : > { %v1607_v9 = vsel %vm1603_vm9, %v1601_v35, 0.0 }
 0x316   : > { %v1608_v13 = vadd.f32 %v1607_v9, %v1606_v57 }
 0x318   : > { %v1590_v41 = vpop.xlane.xlu0 %1589 }
 0x319   : > { %v1594_v1 = vmul.f32 0.00390625, %v1590_v41 }
 0x31b   : > { %v1602_v20 = vmul.f32 %v1598_v8, %v1594_v1 }
 0x31d   : > { %v1609_v63 = vsel %vm1603_vm9, %v1602_v20, 0.0 }
 0x31e   : > { %v1610_v7 = vadd.f32 %v1609_v63, %v1608_v13 }
 0x320   : > { %v1611_v25 = vrot.slane %v1610_v7, 4 }
 0x322   : > { %v1612_v26 = vadd.f32 %v1611_v25, %v1610_v7 }
 0x324   : > { %v1613_v11 = vrot.slane %v1612_v26, 2 }
 0x326   : > { %v1614_v12 = vadd.f32 %v1613_v11, %v1612_v26  ;;  %v1715_v26 = vld [vmem:[%s3589_s12] sm:$0xff] }
 0x328   : > { %v1615_v17 = vrot.slane %v1614_v12, 1 }
 0x32a   : > { %v1616_v28 = vadd.f32 %v1615_v17, %v1614_v12  ;;  %v2226_v12 = vmov 0.0|0.0  }
 0x32b   : > { %2021 = vmatprep.subr.bf16.mxu0 %v2226_v12 }
 0x32c   : > { %v1618_v22 = vadd.f32 %v1617_v29, %v1616_v28  ;;  %v2197_v29 = vld [vmem:[%s2332_s19 + $0x8] sm:$0xff]  ;;  %v2198_v28 = vld [vmem:[%s2332_s19] sm:$0xff] }
 0x32e   : > { %v1975_v30 = vmul.f32 -1.442695, %v1618_v22 }
 0x330   : > { %2177 = vpow2.f32 %v1975_v30  ;;  %v2199_v30 = vld [vmem:[%s2332_s19 + $0x10] sm:$0xff] }
 0x33a   : > { %v2178_v45 = vpop.eup %2177 }
 0x33b   : > { %v1622_v33 = vadd.f32 1.0, %v2178_v45 }
 0x33d   : > { %2179 = vrcp.f32 %v1622_v33 }
 0x347   : > { %v2180_v10 = vpop.eup %2179 }
 0x348   : > { %v1625_v52 = vmul.f32 %v2180_v10, %v1618_v22  ;;  %v3735_v22 = vmov 0.0  }
 0x349   : > { %2010 = vmatprep.mubr.msk.f32.mxu0 %vm2227_vm10, %v3735_v22 }
 0x34a   : > { %v1633_v23 = vrot.slane %v1625_v52, %v3719_v15 }
 0x34c   : > { %v1635_v27 = vmul.f32 %v1633_v23, %v1627_v2  ;;  %v1634_v4 = vmul.f32 %v1633_v23, %v1626_v60  ;;  %v1637_v49 = vmul.f32 %v1633_v23, %v1629_v14  ;;  %v1636_v55 = vmul.f32 %v1633_v23, %v1628_v39 }
 0x34e   : > { %v1641_v59 = vsel %vm1603_vm9, %v1635_v27, 0.0  ;;  %v1638_v24 = vsel %vm1603_vm9, %v1634_v4, 0.0  ;;  %v1647_v15 = vsel %vm1603_vm9, %v1637_v49, 0.0  ;;  %v1644_v44 = vsel %vm1603_vm9, %v1636_v55, 0.0 }
 0x34f   : > { %1642 = vadd.xlane.f32.xlu0 %v1641_v59  ;;  %1639 = vadd.xlane.f32.xlu1 %v1638_v24 }
 0x353   : > { %1648 = vadd.xlane.f32.xlu0 %v1647_v15  ;;  %1645 = vadd.xlane.f32.xlu1 %v1644_v44 }
 0x3dc   : > { %v1643_v36 = vpop.xlane.xlu0 %1642  ;;  %v1640_v51 = vpop.xlane.xlu1 %1639 }
 0x3dd   : > { %v1655_v6 = vadd.f32 %v1651_v37, %v1643_v36  ;;  %v1654_v54 = vadd.f32 %v1650_v32, %v1640_v51 }
 0x3df   : > { %v1977_v31 = vmul.f32 -1.442695, %v1655_v6  ;;  %v1976_v42 = vmul.f32 -1.442695, %v1654_v54 }
 0x3e0   : > { %v1649_v34 = vpop.xlane.xlu0 %1648  ;;  %v1646_v56 = vpop.xlane.xlu1 %1645 }
 0x3e1   : > { %2181 = vpow2.f32 %v1977_v31  ;;  %v1657_v46 = vadd.f32 %v1653_v50, %v1649_v34  ;;  %v1656_v35 = vadd.f32 %v1652_v61, %v1646_v56 }
 0x3e2   : > { %2183 = vpow2.f32 %v1976_v42 }
 0x3e3   : > { %v1979_v38 = vmul.f32 -1.442695, %v1657_v46  ;;  %v1978_v8 = vmul.f32 -1.442695, %v1656_v35 }
 0x3e5   : > { %2185 = vpow2.f32 %v1979_v38 }
 0x3e6   : > { %2187 = vpow2.f32 %v1978_v8 }
 0x3eb   : > { %v2182_v41 = vpop.eup %2181 }
 0x3ec   : > { %v2184_v47 = vpop.eup %2183  ;;  %v1671_v9 = vadd.f32 1.0, %v2182_v41 }
 0x3ed   : > { %v1670_v1 = vadd.f32 1.0, %v2184_v47 }
 0x3ee   : > { %2189 = vrcp.f32 %v1671_v9 }
 0x3ef   : > { %v2186_v57 = vpop.eup %2185  ;;  %2191 = vrcp.f32 %v1670_v1 }
 0x3f0   : > { %v2188_v20 = vpop.eup %2187  ;;  %v1673_v63 = vadd.f32 1.0, %v2186_v57 }
 0x3f1   : > { %v1672_v13 = vadd.f32 1.0, %v2188_v20 }
 0x3f3   : > { %2193 = vrcp.f32 %v1672_v13 }
 0x3f4   : > { %2195 = vrcp.f32 %v1673_v63 }
 0x3f8   : > { %v2190_v7 = vpop.eup %2189 }
 0x3f9   : > { %v2192_v25 = vpop.eup %2191  ;;  %1689 = vperm.xlu0 %2079, %v2190_v7  }
 0x3fa   : > { %1684 = vperm.xlu1 %2080, %v2192_v25  }
 0x3fd   : > { %v2194_v11 = vpop.eup %2193  ;;  %1718 = vperm.xlu0 %2079, %v1715_v26  }
 0x3fe   : > { %1694 = vperm.xlu1 %2080, %v2194_v11   ;;  %v2196_v17 = vpop.eup %2195 }
 0x401   : > { %1868 = vrot.lane.b32.xlu0 %v2197_v29, %s2220_s20 }
 0x402   : > { %1699 = vperm.xlu1 %2080, %v2196_v17  }
 0x406   : > { %1866 = vrot.lane.b32.xlu1 %v2198_v28, %s2220_s20 }
 0x40a   : > { %1870 = vrot.lane.b32.xlu1 %v2199_v30, %s2220_s20 }
 0x478   : > { %v1690_v45 = vpop.permute.xlu0 %1689 }
 0x479   : > { %v1705_v33 = vmul.f32 %v1690_v45, %v3309_v21  ;;  %v1706_v10 = vmul.f32 %v1690_v45, %v3332_v0  ;;  %v1707_v52 = vmul.f32 %v1690_v45, %v3341_v16  ;;  %v1685_v2 = vpop.permute.xlu1 %1684 }
 0x47a   : > { %v1702_v60 = vmul.f32 %v1685_v2, %v3436_v19  ;;  %v1703_v23 = vmul.f32 %v1685_v2, %v3444_v48  ;;  %v1704_v14 = vmul.f32 %v1685_v2, %v3450_v18 }
 0x47c   : > { %v2015_v39 = vpack.c.bf16 %v1705_v33, %v1702_v60  ;;  %v2022_v27 = vpack.c.bf16 %v1707_v52, %v1704_v14  ;;  %v2013_v4 = vpack.c.bf16 %v1706_v10, %v1703_v23 }
 0x47d   : > { %v1695_v59 = vpop.permute.xlu1 %1694 }
 0x47e   : > { %2014 = vmatprep.subr.bf16.mxu1 %v2013_v4  ;;  %2023 = vmatpush3.bf16.msra.mxu0 %v2022_v27  ;;  %v1708_v21 = vmul.f32 %v1695_v59, %v3466_v5  ;;  %v1709_v0 = vmul.f32 %v1695_v59, %v3468_v3  ;;  %v1710_v24 = vmul.f32 %v1695_v59, %v3470_v53  ;;  %v1714_v5 = vld [vmem:[%s3588_s11] sm:$0xff]  ;;  %v1719_v53 = vpop.permute.xlu0 %1718 }
 0x47f   : > { %2016 = vmatpush1.bf16.msra.mxu1 %v2015_v39  ;;  %2024 = vmatprep.subr.bf16.mxu0 %v2226_v12 }
 0x481   : > { %v1700_v16 = vpop.permute.xlu1 %1699 }
 0x482   : > { %v1711_v19 = vmul.f32 %v1700_v16, %v3478_v40  ;;  %v1712_v48 = vmul.f32 %v1700_v16, %v3480_v58  ;;  %v1713_v18 = vmul.f32 %v1700_v16, %v3482_v62  ;;  %v1869_v58 = vpop.permute.xlu0 %1868 }
 0x484   : > { %v2019_v49 = vpack.c.bf16 %v1711_v19, %v1708_v21  ;;  %v2025_v55 = vpack.c.bf16 %v1713_v18, %v1710_v24  ;;  %v2017_v15 = vpack.c.bf16 %v1712_v48, %v1709_v0 }
 0x485   : > { %v1867_v3 = vpop.permute.xlu1 %1866 }
 0x486   : > { %2018 = vmatprep.subr.bf16.mxu1 %v2017_v15  ;;  %2026 = vmatpush3.bf16.msra.mxu0 %v2025_v55  ;;  %v1873_v50 = vsel %vm1065_vm6, %v1867_v3, %v1869_v58 }
 0x487   : > { %2020 = vmatpush1.bf16.msra.mxu1 %v2019_v49 }
 0x489   : > { %2011 = vmatmul.mubr.msk.f32.vlgmr.msra.gmra.mrb[6].mxu0 %vm1721_vm11, %v1714_v5  ;;  %v1871_v40 = vpop.permute.xlu1 %1870 }
 0x48a   : > { %1980 = vmatmul.mubr.msk.f32.vlgmr.msra.gmra.mrb[6].mxu1 %vm1721_vm11, %v1714_v5  ;;  %v1872_v36 = vsel %vm1065_vm6, %v1869_v58, %v1871_v40  ;;  %v1874_v51 = vsel %vm1065_vm6, %v1871_v40, %v1867_v3 }
 0x55c   : > { %v1862_v44 = vpop.f32.mrb[6].mxu0 }
 0x55d   : > { %v1863_v62 = vadd.f32 %v1862_v44, %v1719_v53  ;;  %v1791_v37 = vpop.f32.mrb[6].mxu1  ;;  %v2012_v32 = vpop.f32.mrb[7].mxu0 }
 0x55e   : > { %v1792_v6 = vadd.f32 %v1791_v37, %v1719_v53  ;;  %v1793_v54 = vpop.f32.mrb[7].mxu1 }
 0x55f   : > { %v1877_v61 = vadd.f32 %v1874_v51, %v1863_v62  ;;  %v1794_v31 = vadd.f32 %v1793_v54, %v1719_v53 }
 0x560   : > { %v1875_v42 = vadd.f32 %v1873_v50, %v1792_v6 }
 0x561   : > { %1880 = vst [vmem:[%s440_s28 + $0x10] sm:$0xff] %v1877_v61  ;;  %v1876_v34 = vadd.f32 %v1872_v36, %v1794_v31 }
 0x562   : > { %1878 = vst [vmem:[%s440_s28] sm:$0xff] %v1875_v42 }
 0x563   : > { %1879 = vst [vmem:[%s440_s28 + $0x8] sm:$0xff] %v1876_v34 }
 0x564 PF: > { %s23_s25 = sadd.s32 1, %s2206_s25  }
 0x565   : > { %p20_p4 = scmp.ge.s32.totalorder %s23_s25, 4  }
 0x567   :  { %22 = sbr.rel (!%p20_p4) target bundleno = 1 (0x1), region = 102 }

</bundles_post_ra>
